<compile_context>
chip_gen: v7x
topology: tpu7x:2x2x1
jax: 0.10.0
libtpu: 0.0.40
codegen_flags: <defaults>
</compile_context>

<pallas_src>
import numpy as np
import jax
import jax.numpy as jnp
from jax.experimental import pallas as pl
from jax.experimental.pallas import tpu as pltpu

IN_CHANNELS = 2                                     # module only consistent for 2
SIG_DEPTH = 3
OUT_DIM = 3
HIDDEN = 64
AUG = 2 * IN_CHANNELS                               # 4 augmented channels
LVL = [AUG ** k for k in range(1, SIG_DEPTH + 1)]   # [4, 16, 64]
SIG_CHANNELS = sum(LVL)                             # 84
FEAT_DIM = SIG_CHANNELS + IN_CHANNELS               # 86
FEAT_PAD = 128                                      # lane-padded feature width
OUT_PAD = 128                                       # lane-padded output width

# ---- packed parameter slab layout (rows x 128 lanes, f32) -------------------
_R_AUGM = 0                     # 2 rows : [I | conv_w]            lanes 0:4
_R_AUGB = 2                     # 1 row  : [0 | conv_b]            lanes 0:4
_R_B1 = 3                       # 1 row  : linear1 bias            lanes 0:64
_R_B2 = 4                       # 1 row  : linear2 bias (padded)   lanes 0:128
_R_W1 = 8                       # 128 rows: padded linear1 weight  lanes 0:64
_R_W2 = _R_W1 + FEAT_PAD        # 64 rows : padded linear2 weight  lanes 0:128
_R_RD = _R_W2 + HIDDEN          # 4 rows : [Eb44 | Ea44 | Eb16x4]  lanes 0:96
_R_RE2 = _R_RD + 8              # 16 rows: [Ea16x4 | Eb4x16]       lanes 0:128
_R_RS1 = _R_RE2 + 16            # 4 rows : [Ea44 | Ea4x16]         lanes 0:80
P_ROWS = _R_RS1 + 8             # 232 (multiple of 8)

_RD_W = 2 * LVL[1] + LVL[2]     # 96
_RS1_W = LVL[1] + LVL[2]        # 80

# ---- lane offsets inside the per-step staging slab ---------------------------
_S_T3 = 0                       # term3 (carry-free sig3 increment)   64 lanes
_S_RB164 = 64                   # d_t @ eb16x4                        64 lanes
_S_TA = 128                     # term2 @ ea16x4                      64 lanes
_S_T2 = 192                     # term2 (carry-free sig2 increment)   16 lanes
STAGE_W = 256


# -----------------------------------------------------------------------------
# host-side helper: 0/1 expansion matrices s.t. (a@Ea)*(b@Eb) == row-major outer
# -----------------------------------------------------------------------------
def expansion_mats(n, m):
    ea = np.zeros((n, n * m), dtype=np.float32)
    eb = np.zeros((m, n * m), dtype=np.float32)
    for i in range(n):
        ea[i, i * m:(i + 1) * m] = 1.0
    for j in range(m):
        eb[j, j::m] = 1.0
    return ea, eb


# -----------------------------------------------------------------------------
# Pallas kernel
# -----------------------------------------------------------------------------
def make_dstq_kernel(L, BT):
    C = IN_CHANNELS
    R = L * BT

    def kernel(seq_ref, par_ref, out_ref, feat_ref, stage_ref):
        f32 = jnp.float32

        def fdot(a, b):
            return jnp.dot(a, b, preferred_element_type=f32)

        # ---- parameters needed by the batched prologue -----------------------
        aug_m = par_ref[_R_AUGM:_R_AUGM + C, 0:AUG]            # (2, 4)
        aug_b = par_ref[_R_AUGB:_R_AUGB + 1, 0:AUG]            # (1, 4)
        rhs_d = par_ref[_R_RD:_R_RD + AUG, 0:_RD_W]            # (4, 96)
        rhs_e2 = par_ref[_R_RE2:_R_RE2 + LVL[1], :]            # (16, 128)
        ea16x4 = par_ref[_R_RE2:_R_RE2 + LVL[1], 0:LVL[2]]     # (16, 64)
        rhs_s1 = par_ref[_R_RS1:_R_RS1 + AUG, 0:_RS1_W]        # (4, 80)

        # ---- batched prologue: everything is off the serial chain ------------
        x = seq_ref[...]                                       # (L*BT, 2)
        # augment on the VPU (a K=2, N=4 matmul is not worth an MXU round trip)
        a_pts = x[:, 0:1] * aug_m[0:1, :] + x[:, 1:2] * aug_m[1:2, :] + aug_b

        # previous augmented point A[t-1] (zeros for t=0): in-register sublane
        # shift (no VMEM store/load round trip).
        if L > 1:
            a_prev = jnp.concatenate(
                [jnp.zeros((BT, AUG), f32), a_pts[0:R - BT, :]], axis=0)
        else:
            a_prev = jnp.zeros((R, AUG), f32)
        d_all = a_pts - a_prev                                 # basepoint deltas

        # exp(D_t) levels for every t, batched
        pd = fdot(d_all, rhs_d)                                # (L*BT, 96)
        rb44 = pd[:, 0:LVL[1]]                                 # d @ eb44
        ra44 = pd[:, LVL[1]:2 * LVL[1]]                        # d @ ea44
        rb164 = pd[:, 2 * LVL[1]:_RD_W]                        # d @ eb16x4
        e2_all = 0.5 * ra44 * rb44                             # (L*BT, 16)
        pe2 = fdot(e2_all, rhs_e2)                             # (L*BT, 128)
        e3_all = (1.0 / 3.0) * pe2[:, 0:LVL[2]] * rb164        # (L*BT, 64)
        rb416 = pe2[:, LVL[2]:]                                # e2 @ eb4x16

        # sig1_{t-1} expansions, batched (sig1 before step t == A[t-1])
        ps1_prev = fdot(a_prev, rhs_s1)                        # (L*BT, 80)
        pa44_prev = ps1_prev[:, 0:LVL[1]]                      # A[t-1] @ ea44
        pa416_prev = ps1_prev[:, LVL[1]:]                      # A[t-1] @ ea4x16

        # carry-free per-step increments (Chen identity, depth 3)
        term2_all = e2_all + pa44_prev * rb44                  # sig2 increment
        ta_all = fdot(term2_all, ea16x4)                       # increments of sig2@ea16x4
        term3_all = e3_all + pa416_prev * rb416                # sig3 incr. minus cross term

        # stage loop operands in VMEM (bounds vreg live ranges for large BT*L)
        stage_ref[:, _S_T3:_S_T3 + LVL[2]] = term3_all
        stage_ref[:, _S_RB164:_S_RB164 + LVL[2]] = rb164
        stage_ref[:, _S_TA:_S_TA + LVL[2]] = ta_all
        stage_ref[:, _S_T2:_S_T2 + LVL[1]] = term2_all

        # ---- serial Chen recursion: pure VPU prefix sums (no MXU on chain) ---
        sig3 = stage_ref[0:BT, _S_T3:_S_T3 + LVL[2]]
        sig2 = stage_ref[0:BT, _S_T2:_S_T2 + LVL[1]]
        a2 = stage_ref[0:BT, _S_TA:_S_TA + LVL[2]]             # sig2_{t-1} @ ea16x4
        # TODO(synk): switch to lax.fori_loop(..., unroll>=2) if L grows beyond ~16.
        for t in range(1, L):
            lo = t * BT
            hi = lo + BT
            sig3 = (sig3 + stage_ref[lo:hi, _S_T3:_S_T3 + LVL[2]]
                    + a2 * stage_ref[lo:hi, _S_RB164:_S_RB164 + LVL[2]])
            sig2 = sig2 + stage_ref[lo:hi, _S_T2:_S_T2 + LVL[1]]
            a2 = a2 + stage_ref[lo:hi, _S_TA:_S_TA + LVL[2]]

        # ---- epilogue: lane-dense feature slab, single K=128 linear1 ---------
        xl = seq_ref[(L - 1) * BT:R, :]                        # last observation
        sig1 = xl[:, 0:1] * aug_m[0:1, :] + xl[:, 1:2] * aug_m[1:2, :] + aug_b
        feat_ref[:, 0:LVL[0]] = sig1
        feat_ref[:, LVL[0]:LVL[0] + LVL[1]] = sig2
        feat_ref[:, LVL[0] + LVL[1]:SIG_CHANNELS] = sig3
        feat_ref[:, SIG_CHANNELS:FEAT_DIM] = xl
        feat_ref[:, FEAT_DIM:] = jnp.zeros((BT, FEAT_PAD - FEAT_DIM), f32)

        w1 = par_ref[_R_W1:_R_W1 + FEAT_PAD, 0:HIDDEN]         # (128, 64)
        b1 = par_ref[_R_B1:_R_B1 + 1, 0:HIDDEN]                # (1, 64)
        w2 = par_ref[_R_W2:_R_W2 + HIDDEN, :]                  # (64, 128)
        b2 = par_ref[_R_B2:_R_B2 + 1, :]                       # (1, 128)
        h = jnp.maximum(fdot(feat_ref[...], w1) + b1, 0.0)     # (BT, 64)
        out_ref[...] = fdot(h, w2) + b2                        # (BT, 128)

    return kernel


# -----------------------------------------------------------------------------
# wrapper
# -----------------------------------------------------------------------------
def dstq_forward(seq, aug_w, aug_b, w1, b1, w2, b2):
    """seq: (B, L, C) f32 channels-last. Returns (B, OUT_DIM)."""
    seq = jnp.asarray(seq, jnp.float32)
    B, L, C = seq.shape
    assert C == IN_CHANNELS
    OUT = w2.shape[1]

    def rup(v, m):
        return (v + m - 1) // m * m

    # batch tile: cap at 128 rows; for B >= 16 this yields >= 2 grid blocks so
    # both v7x TensorCores get work (grid axis is "parallel").
    BT = min(128, rup(max(1, -(-B // 2)), 8))
    Bp = rup(B, BT)
    nblk = Bp // BT

    # time-major, batch-blocked layout (host-side layout plumbing only)
    seq_p = jnp.pad(seq, ((0, Bp - B), (0, 0), (0, 0)))
    seq_blk = (seq_p.reshape(nblk, BT, L, C)
               .transpose(0, 2, 1, 3)
               .reshape(nblk * L * BT, C))

    # single packed parameter slab (one DMA for all weights + constants)
    ea44, eb44 = expansion_mats(LVL[0], LVL[0])        # (4,16), (4,16)
    ea4x16, eb4x16 = expansion_mats(LVL[0], LVL[1])    # (4,64), (16,64)
    ea16x4, eb16x4 = expansion_mats(LVL[1], LVL[0])    # (16,64), (4,64)

    slab = np.zeros((P_ROWS, 128), np.float32)
    slab[_R_AUGM:_R_AUGM + C, 0:C] = np.eye(C, dtype=np.float32)
    slab[_R_AUGM:_R_AUGM + C, C:AUG] = np.asarray(aug_w, np.float32)
    slab[_R_AUGB, C:AUG] = np.asarray(aug_b, np.float32)
    slab[_R_B1, 0:HIDDEN] = np.asarray(b1, np.float32).reshape(-1)
    slab[_R_B2, 0:OUT] = np.asarray(b2, np.float32).reshape(-1)
    slab[_R_W1:_R_W1 + FEAT_DIM, 0:HIDDEN] = np.asarray(w1, np.float32)
    slab[_R_W2:_R_W2 + HIDDEN, 0:OUT] = np.asarray(w2, np.float32)
    slab[_R_RD:_R_RD + AUG, 0:_RD_W] = np.concatenate([eb44, ea44, eb16x4], axis=1)
    slab[_R_RE2:_R_RE2 + LVL[1], 0:128] = np.concatenate([ea16x4, eb4x16], axis=1)
    slab[_R_RS1:_R_RS1 + AUG, 0:_RS1_W] = np.concatenate([ea44, ea4x16], axis=1)
    slab = jnp.asarray(slab)

    out_pad = pl.pallas_call(
        make_dstq_kernel(L, BT),
        out_shape=jax.ShapeDtypeStruct((Bp, OUT_PAD), jnp.float32),
        grid=(nblk,),
        in_specs=[
            pl.BlockSpec((L * BT, C), lambda i: (i, 0)),
            pl.BlockSpec((P_ROWS, 128), lambda i: (0, 0)),
        ],
        out_specs=pl.BlockSpec((BT, OUT_PAD), lambda i: (i, 0)),
        scratch_shapes=[
            pltpu.VMEM((BT, FEAT_PAD), jnp.float32),           # feature slab
            pltpu.VMEM((L * BT, STAGE_W), jnp.float32),        # per-step operand slab
        ],
        compiler_params=pltpu.CompilerParams(
            dimension_semantics=("parallel",)),
    )(seq_blk, slab)
    return out_pad[:B, :OUT]


# -----------------------------------------------------------------------------
# pure-JAX reference (same math, plain XLA) for a sanity check
# -----------------------------------------------------------------------------
def dstq_reference(seq, aug_w, aug_b, w1, b1, w2, b2, depth=SIG_DEPTH):
    B, L, C = seq.shape
    c = 2 * C
    conv = jnp.einsum("blc,cd->bld", seq, aug_w) + aug_b[None, None, :]
    path = jnp.concatenate([seq, conv], axis=-1)                       # (B, L, 2C)
    path = jnp.concatenate([jnp.zeros((B, 1, c), seq.dtype), path], axis=1)
    deltas = path[:, 1:] - path[:, :-1]                                # (B, L, 2C)

    def outer(a, b):
        return (a[:, :, None] * b[:, None, :]).reshape(B, -1)

    def exp_lv(d):
        lv = [d]
        for k in range(2, depth + 1):
            lv.append(outer(lv[-1], d) / float(k))
        return lv

    sig = exp_lv(deltas[:, 0])
    for t in range(1, L):
        e = exp_lv(deltas[:, t])
        new = []
        for k in range(depth, 0, -1):
            acc = sig[k - 1] + e[k - 1]
            for j in range(1, k):
                acc = acc + outer(sig[j - 1], e[k - j - 1])
            new.append(acc)
        sig = new[::-1]
    feat = jnp.concatenate(sig + [seq[:, -1, :]], axis=-1)             # (B, 86)
    h = jax.nn.relu(feat @ w1 + b1)
    return h @ w2 + b2


# -----------------------------------------------------------------------------
if __name__ == "__main__":
    B, L = 2, 8
    key = jax.random.PRNGKey(0)
    ks = jax.random.split(key, 8)

    seq = jax.random.normal(ks[0], (B, L, IN_CHANNELS), jnp.float32) * 0.5
    aug_w = jax.random.normal(ks[1], (IN_CHANNELS, IN_CHANNELS), jnp.float32) * 0.5
    aug_b = jax.random.normal(ks[2], (IN_CHANNELS,), jnp.float32) * 0.1
    w1 = jax.random.normal(ks[3], (FEAT_DIM, HIDDEN), jnp.float32) * 0.08
    b1 = jax.random.normal(ks[4], (1, HIDDEN), jnp.float32) * 0.05
    w2 = jax.random.normal(ks[5], (HIDDEN, OUT_DIM), jnp.float32) * 0.1
    b2 = jax.random.normal(ks[6], (1, OUT_DIM), jnp.float32) * 0.05

    out = dstq_forward(seq, aug_w, aug_b, w1, b1, w2, b2)
    out = jax.block_until_ready(out)

    ref = dstq_reference(seq, aug_w, aug_b, w1, b1, w2, b2)
    ref = jax.block_until_ready(ref)

    if out.shape != (B, OUT_DIM):
        raise RuntimeError(f"bad output shape {out.shape}")
    if not bool(jnp.allclose(out, ref, atol=2e-2, rtol=2e-2)):
        raise RuntimeError(f"kernel/reference mismatch:\n{out}\nvs\n{ref}")

    print("KERNEL_OK")
</pallas_src>

<mosaic_0001>
module attributes {stable_mosaic.version = 11 : i64} {
  func.func @kernel(%arg0: i32, %arg1: memref<64x2xf32, #tpu.memory_space<vmem>>, %arg2: memref<232x128xf32, #tpu.memory_space<vmem>>, %arg3: memref<8x128xf32, #tpu.memory_space<vmem>>, %arg4: memref<8x128xf32, #tpu.memory_space<vmem>>, %arg5: memref<64x256xf32, #tpu.memory_space<vmem>>) attributes {dimension_semantics = [#tpu.dimension_semantics<parallel>], iteration_bounds = array<i64: 1>, scalar_prefetch = 0 : i64, scratch_operands = 2 : i64, tpu.core_type = #tpu.core_type<tc>, window_params = [{transform_indices = @transform_0, window_bounds = array<i64: 64, 2>}, {pipeline_mode = #tpu.pipeline_mode<synchronous>, transform_indices = @transform_1, window_bounds = array<i64: 232, 128>}, {transform_indices = @transform_2, window_bounds = array<i64: 8, 128>}]} {
    %c0 = arith.constant 0 : index
    %c0_0 = arith.constant 0 : index
    %0 = vector.load %arg2[%c0, %c0_0] : memref<232x128xf32, #tpu.memory_space<vmem>>, vector<2x4xf32>
    %c2 = arith.constant 2 : index
    %c0_1 = arith.constant 0 : index
    %1 = vector.load %arg2[%c2, %c0_1] : memref<232x128xf32, #tpu.memory_space<vmem>>, vector<1x4xf32>
    %c200 = arith.constant 200 : index
    %c0_2 = arith.constant 0 : index
    %2 = vector.load %arg2[%c200, %c0_2] : memref<232x128xf32, #tpu.memory_space<vmem>>, vector<4x96xf32>
    %c208 = arith.constant 208 : index
    %c0_3 = arith.constant 0 : index
    %3 = vector.load %arg2[%c208, %c0_3] : memref<232x128xf32, #tpu.memory_space<vmem>>, vector<16x128xf32>
    %c208_4 = arith.constant 208 : index
    %c0_5 = arith.constant 0 : index
    %4 = vector.load %arg2[%c208_4, %c0_5] : memref<232x128xf32, #tpu.memory_space<vmem>>, vector<16x64xf32>
    %c224 = arith.constant 224 : index
    %c0_6 = arith.constant 0 : index
    %5 = vector.load %arg2[%c224, %c0_6] : memref<232x128xf32, #tpu.memory_space<vmem>>, vector<4x80xf32>
    %c0_7 = arith.constant 0 : index
    %c0_8 = arith.constant 0 : index
    %6 = vector.load %arg1[%c0_7, %c0_8] : memref<64x2xf32, #tpu.memory_space<vmem>>, vector<64x2xf32>
    %7 = vector.extract_strided_slice %6 {offsets = [0, 0], sizes = [64, 1], strides = [1, 1]} : vector<64x2xf32> to vector<64x1xf32>
    %8 = vector.extract_strided_slice %0 {offsets = [0, 0], sizes = [1, 4], strides = [1, 1]} : vector<2x4xf32> to vector<1x4xf32>
    %9 = vector.broadcast %7 : vector<64x1xf32> to vector<64x4xf32>
    %10 = vector.broadcast %8 : vector<1x4xf32> to vector<64x4xf32>
    %11 = arith.mulf %9, %10 : vector<64x4xf32>
    %12 = vector.extract_strided_slice %6 {offsets = [0, 1], sizes = [64, 1], strides = [1, 1]} : vector<64x2xf32> to vector<64x1xf32>
    %13 = vector.extract_strided_slice %0 {offsets = [1, 0], sizes = [1, 4], strides = [1, 1]} : vector<2x4xf32> to vector<1x4xf32>
    %14 = vector.broadcast %12 : vector<64x1xf32> to vector<64x4xf32>
    %15 = vector.broadcast %13 : vector<1x4xf32> to vector<64x4xf32>
    %16 = arith.mulf %14, %15 : vector<64x4xf32>
    %17 = arith.addf %11, %16 : vector<64x4xf32>
    %18 = vector.broadcast %1 : vector<1x4xf32> to vector<64x4xf32>
    %19 = arith.addf %17, %18 : vector<64x4xf32>
    %cst = arith.constant 0.000000e+00 : f32
    %20 = vector.broadcast %cst : f32 to vector<8x4xf32>
    %21 = vector.extract_strided_slice %19 {offsets = [0, 0], sizes = [56, 4], strides = [1, 1]} : vector<64x4xf32> to vector<56x4xf32>
    %22 = tpu.concatenate %20, %21 in 0 : vector<8x4xf32>, vector<56x4xf32> -> vector<64x4xf32>
    %23 = arith.subf %19, %22 : vector<64x4xf32>
    %cst_9 = arith.constant dense<0.000000e+00> : vector<64x96xf32>
    %24 = tpu.matmul %23, %2, %cst_9 {dimension_numbers = #tpu.dot_dimension_numbers<[1], [0], [0], [1], [0, 0, 1, 1], [], []>} : vector<64x4xf32>, vector<4x96xf32>, vector<64x96xf32> -> vector<64x96xf32>
    %25 = vector.extract_strided_slice %24 {offsets = [0, 0], sizes = [64, 16], strides = [1, 1]} : vector<64x96xf32> to vector<64x16xf32>
    %26 = vector.extract_strided_slice %24 {offsets = [0, 16], sizes = [64, 16], strides = [1, 1]} : vector<64x96xf32> to vector<64x16xf32>
    %27 = vector.extract_strided_slice %24 {offsets = [0, 32], sizes = [64, 64], strides = [1, 1]} : vector<64x96xf32> to vector<64x64xf32>
    %cst_10 = arith.constant 5.000000e-01 : f32
    %28 = vector.broadcast %cst_10 : f32 to vector<64x16xf32>
    %29 = arith.mulf %28, %26 : vector<64x16xf32>
    %30 = arith.mulf %29, %25 : vector<64x16xf32>
    %cst_11 = arith.constant dense<0.000000e+00> : vector<64x128xf32>
    %31 = tpu.matmul %30, %3, %cst_11 {dimension_numbers = #tpu.dot_dimension_numbers<[1], [0], [0], [1], [0, 0, 1, 1], [], []>} : vector<64x16xf32>, vector<16x128xf32>, vector<64x128xf32> -> vector<64x128xf32>
    %32 = vector.extract_strided_slice %31 {offsets = [0, 0], sizes = [64, 64], strides = [1, 1]} : vector<64x128xf32> to vector<64x64xf32>
    %cst_12 = arith.constant 0.333333343 : f32
    %33 = vector.broadcast %cst_12 : f32 to vector<64x64xf32>
    %34 = arith.mulf %33, %32 : vector<64x64xf32>
    %35 = arith.mulf %34, %27 : vector<64x64xf32>
    %36 = vector.extract_strided_slice %31 {offsets = [0, 64], sizes = [64, 64], strides = [1, 1]} : vector<64x128xf32> to vector<64x64xf32>
    %cst_13 = arith.constant dense<0.000000e+00> : vector<64x80xf32>
    %37 = tpu.matmul %22, %5, %cst_13 {dimension_numbers = #tpu.dot_dimension_numbers<[1], [0], [0], [1], [0, 0, 1, 1], [], []>} : vector<64x4xf32>, vector<4x80xf32>, vector<64x80xf32> -> vector<64x80xf32>
    %38 = vector.extract_strided_slice %37 {offsets = [0, 0], sizes = [64, 16], strides = [1, 1]} : vector<64x80xf32> to vector<64x16xf32>
    %39 = vector.extract_strided_slice %37 {offsets = [0, 16], sizes = [64, 64], strides = [1, 1]} : vector<64x80xf32> to vector<64x64xf32>
    %40 = arith.mulf %38, %25 : vector<64x16xf32>
    %41 = arith.addf %30, %40 : vector<64x16xf32>
    %cst_14 = arith.constant dense<0.000000e+00> : vector<64x64xf32>
    %42 = tpu.matmul %41, %4, %cst_14 {dimension_numbers = #tpu.dot_dimension_numbers<[1], [0], [0], [1], [0, 0, 1, 1], [], []>} : vector<64x16xf32>, vector<16x64xf32>, vector<64x64xf32> -> vector<64x64xf32>
    %43 = arith.mulf %39, %36 : vector<64x64xf32>
    %44 = arith.addf %35, %43 : vector<64x64xf32>
    %c0_15 = arith.constant 0 : index
    %c0_16 = arith.constant 0 : index
    %45 = vector.load %arg5[%c0_15, %c0_16] : memref<64x256xf32, #tpu.memory_space<vmem>>, vector<64x64xf32>
    tpu.vector_store %arg5[%c0_15, %c0_16], %44 {strides = array<i32>} : memref<64x256xf32, #tpu.memory_space<vmem>>, vector<64x64xf32>,
    %c0_17 = arith.constant 0 : index
    %c64 = arith.constant 64 : index
    %46 = vector.load %arg5[%c0_17, %c64] : memref<64x256xf32, #tpu.memory_space<vmem>>, vector<64x64xf32>
    tpu.vector_store %arg5[%c0_17, %c64], %27 {strides = array<i32>} : memref<64x256xf32, #tpu.memory_space<vmem>>, vector<64x64xf32>,
    %c0_18 = arith.constant 0 : index
    %c128 = arith.constant 128 : index
    %47 = vector.load %arg5[%c0_18, %c128] : memref<64x256xf32, #tpu.memory_space<vmem>>, vector<64x64xf32>
    tpu.vector_store %arg5[%c0_18, %c128], %42 {strides = array<i32>} : memref<64x256xf32, #tpu.memory_space<vmem>>, vector<64x64xf32>,
    %c0_19 = arith.constant 0 : index
    %c192 = arith.constant 192 : index
    %48 = vector.load %arg5[%c0_19, %c192] : memref<64x256xf32, #tpu.memory_space<vmem>>, vector<64x16xf32>
    tpu.vector_store %arg5[%c0_19, %c192], %41 {strides = array<i32>} : memref<64x256xf32, #tpu.memory_space<vmem>>, vector<64x16xf32>,
    %c0_20 = arith.constant 0 : index
    %c0_21 = arith.constant 0 : index
    %49 = vector.load %arg5[%c0_20, %c0_21] : memref<64x256xf32, #tpu.memory_space<vmem>>, vector<8x64xf32>
    %c0_22 = arith.constant 0 : index
    %c192_23 = arith.constant 192 : index
    %50 = vector.load %arg5[%c0_22, %c192_23] : memref<64x256xf32, #tpu.memory_space<vmem>>, vector<8x16xf32>
    %c0_24 = arith.constant 0 : index
    %c128_25 = arith.constant 128 : index
    %51 = vector.load %arg5[%c0_24, %c128_25] : memref<64x256xf32, #tpu.memory_space<vmem>>, vector<8x64xf32>
    %c8 = arith.constant 8 : index
    %c0_26 = arith.constant 0 : index
    %52 = vector.load %arg5[%c8, %c0_26] : memref<64x256xf32, #tpu.memory_space<vmem>>, vector<8x64xf32>
    %53 = arith.addf %49, %52 : vector<8x64xf32>
    %c8_27 = arith.constant 8 : index
    %c64_28 = arith.constant 64 : index
    %54 = vector.load %arg5[%c8_27, %c64_28] : memref<64x256xf32, #tpu.memory_space<vmem>>, vector<8x64xf32>
    %55 = arith.mulf %51, %54 : vector<8x64xf32>
    %56 = arith.addf %53, %55 : vector<8x64xf32>
    %c8_29 = arith.constant 8 : index
    %c192_30 = arith.constant 192 : index
    %57 = vector.load %arg5[%c8_29, %c192_30] : memref<64x256xf32, #tpu.memory_space<vmem>>, vector<8x16xf32>
    %58 = arith.addf %50, %57 : vector<8x16xf32>
    %c8_31 = arith.constant 8 : index
    %c128_32 = arith.constant 128 : index
    %59 = vector.load %arg5[%c8_31, %c128_32] : memref<64x256xf32, #tpu.memory_space<vmem>>, vector<8x64xf32>
    %60 = arith.addf %51, %59 : vector<8x64xf32>
    %c16 = arith.constant 16 : index
    %c0_33 = arith.constant 0 : index
    %61 = vector.load %arg5[%c16, %c0_33] : memref<64x256xf32, #tpu.memory_space<vmem>>, vector<8x64xf32>
    %62 = arith.addf %56, %61 : vector<8x64xf32>
    %c16_34 = arith.constant 16 : index
    %c64_35 = arith.constant 64 : index
    %63 = vector.load %arg5[%c16_34, %c64_35] : memref<64x256xf32, #tpu.memory_space<vmem>>, vector<8x64xf32>
    %64 = arith.mulf %60, %63 : vector<8x64xf32>
    %65 = arith.addf %62, %64 : vector<8x64xf32>
    %c16_36 = arith.constant 16 : index
    %c192_37 = arith.constant 192 : index
    %66 = vector.load %arg5[%c16_36, %c192_37] : memref<64x256xf32, #tpu.memory_space<vmem>>, vector<8x16xf32>
    %67 = arith.addf %58, %66 : vector<8x16xf32>
    %c16_38 = arith.constant 16 : index
    %c128_39 = arith.constant 128 : index
    %68 = vector.load %arg5[%c16_38, %c128_39] : memref<64x256xf32, #tpu.memory_space<vmem>>, vector<8x64xf32>
    %69 = arith.addf %60, %68 : vector<8x64xf32>
    %c24 = arith.constant 24 : index
    %c0_40 = arith.constant 0 : index
    %70 = vector.load %arg5[%c24, %c0_40] : memref<64x256xf32, #tpu.memory_space<vmem>>, vector<8x64xf32>
    %71 = arith.addf %65, %70 : vector<8x64xf32>
    %c24_41 = arith.constant 24 : index
    %c64_42 = arith.constant 64 : index
    %72 = vector.load %arg5[%c24_41, %c64_42] : memref<64x256xf32, #tpu.memory_space<vmem>>, vector<8x64xf32>
    %73 = arith.mulf %69, %72 : vector<8x64xf32>
    %74 = arith.addf %71, %73 : vector<8x64xf32>
    %c24_43 = arith.constant 24 : index
    %c192_44 = arith.constant 192 : index
    %75 = vector.load %arg5[%c24_43, %c192_44] : memref<64x256xf32, #tpu.memory_space<vmem>>, vector<8x16xf32>
    %76 = arith.addf %67, %75 : vector<8x16xf32>
    %c24_45 = arith.constant 24 : index
    %c128_46 = arith.constant 128 : index
    %77 = vector.load %arg5[%c24_45, %c128_46] : memref<64x256xf32, #tpu.memory_space<vmem>>, vector<8x64xf32>
    %78 = arith.addf %69, %77 : vector<8x64xf32>
    %c32 = arith.constant 32 : index
    %c0_47 = arith.constant 0 : index
    %79 = vector.load %arg5[%c32, %c0_47] : memref<64x256xf32, #tpu.memory_space<vmem>>, vector<8x64xf32>
    %80 = arith.addf %74, %79 : vector<8x64xf32>
    %c32_48 = arith.constant 32 : index
    %c64_49 = arith.constant 64 : index
    %81 = vector.load %arg5[%c32_48, %c64_49] : memref<64x256xf32, #tpu.memory_space<vmem>>, vector<8x64xf32>
    %82 = arith.mulf %78, %81 : vector<8x64xf32>
    %83 = arith.addf %80, %82 : vector<8x64xf32>
    %c32_50 = arith.constant 32 : index
    %c192_51 = arith.constant 192 : index
    %84 = vector.load %arg5[%c32_50, %c192_51] : memref<64x256xf32, #tpu.memory_space<vmem>>, vector<8x16xf32>
    %85 = arith.addf %76, %84 : vector<8x16xf32>
    %c32_52 = arith.constant 32 : index
    %c128_53 = arith.constant 128 : index
    %86 = vector.load %arg5[%c32_52, %c128_53] : memref<64x256xf32, #tpu.memory_space<vmem>>, vector<8x64xf32>
    %87 = arith.addf %78, %86 : vector<8x64xf32>
    %c40 = arith.constant 40 : index
    %c0_54 = arith.constant 0 : index
    %88 = vector.load %arg5[%c40, %c0_54] : memref<64x256xf32, #tpu.memory_space<vmem>>, vector<8x64xf32>
    %89 = arith.addf %83, %88 : vector<8x64xf32>
    %c40_55 = arith.constant 40 : index
    %c64_56 = arith.constant 64 : index
    %90 = vector.load %arg5[%c40_55, %c64_56] : memref<64x256xf32, #tpu.memory_space<vmem>>, vector<8x64xf32>
    %91 = arith.mulf %87, %90 : vector<8x64xf32>
    %92 = arith.addf %89, %91 : vector<8x64xf32>
    %c40_57 = arith.constant 40 : index
    %c192_58 = arith.constant 192 : index
    %93 = vector.load %arg5[%c40_57, %c192_58] : memref<64x256xf32, #tpu.memory_space<vmem>>, vector<8x16xf32>
    %94 = arith.addf %85, %93 : vector<8x16xf32>
    %c40_59 = arith.constant 40 : index
    %c128_60 = arith.constant 128 : index
    %95 = vector.load %arg5[%c40_59, %c128_60] : memref<64x256xf32, #tpu.memory_space<vmem>>, vector<8x64xf32>
    %96 = arith.addf %87, %95 : vector<8x64xf32>
    %c48 = arith.constant 48 : index
    %c0_61 = arith.constant 0 : index
    %97 = vector.load %arg5[%c48, %c0_61] : memref<64x256xf32, #tpu.memory_space<vmem>>, vector<8x64xf32>
    %98 = arith.addf %92, %97 : vector<8x64xf32>
    %c48_62 = arith.constant 48 : index
    %c64_63 = arith.constant 64 : index
    %99 = vector.load %arg5[%c48_62, %c64_63] : memref<64x256xf32, #tpu.memory_space<vmem>>, vector<8x64xf32>
    %100 = arith.mulf %96, %99 : vector<8x64xf32>
    %101 = arith.addf %98, %100 : vector<8x64xf32>
    %c48_64 = arith.constant 48 : index
    %c192_65 = arith.constant 192 : index
    %102 = vector.load %arg5[%c48_64, %c192_65] : memref<64x256xf32, #tpu.memory_space<vmem>>, vector<8x16xf32>
    %103 = arith.addf %94, %102 : vector<8x16xf32>
    %c48_66 = arith.constant 48 : index
    %c128_67 = arith.constant 128 : index
    %104 = vector.load %arg5[%c48_66, %c128_67] : memref<64x256xf32, #tpu.memory_space<vmem>>, vector<8x64xf32>
    %105 = arith.addf %96, %104 : vector<8x64xf32>
    %c56 = arith.constant 56 : index
    %c0_68 = arith.constant 0 : index
    %106 = vector.load %arg5[%c56, %c0_68] : memref<64x256xf32, #tpu.memory_space<vmem>>, vector<8x64xf32>
    %107 = arith.addf %101, %106 : vector<8x64xf32>
    %c56_69 = arith.constant 56 : index
    %c64_70 = arith.constant 64 : index
    %108 = vector.load %arg5[%c56_69, %c64_70] : memref<64x256xf32, #tpu.memory_space<vmem>>, vector<8x64xf32>
    %109 = arith.mulf %105, %108 : vector<8x64xf32>
    %110 = arith.addf %107, %109 : vector<8x64xf32>
    %c56_71 = arith.constant 56 : index
    %c192_72 = arith.constant 192 : index
    %111 = vector.load %arg5[%c56_71, %c192_72] : memref<64x256xf32, #tpu.memory_space<vmem>>, vector<8x16xf32>
    %112 = arith.addf %103, %111 : vector<8x16xf32>
    %c56_73 = arith.constant 56 : index
    %c0_74 = arith.constant 0 : index
    %113 = vector.load %arg1[%c56_73, %c0_74] : memref<64x2xf32, #tpu.memory_space<vmem>>, vector<8x2xf32>
    %114 = vector.extract_strided_slice %113 {offsets = [0, 0], sizes = [8, 1], strides = [1, 1]} : vector<8x2xf32> to vector<8x1xf32>
    %115 = vector.extract_strided_slice %0 {offsets = [0, 0], sizes = [1, 4], strides = [1, 1]} : vector<2x4xf32> to vector<1x4xf32>
    %116 = vector.broadcast %114 : vector<8x1xf32> to vector<8x4xf32>
    %117 = vector.broadcast %115 : vector<1x4xf32> to vector<8x4xf32>
    %118 = arith.mulf %116, %117 : vector<8x4xf32>
    %119 = vector.extract_strided_slice %113 {offsets = [0, 1], sizes = [8, 1], strides = [1, 1]} : vector<8x2xf32> to vector<8x1xf32>
    %120 = vector.extract_strided_slice %0 {offsets = [1, 0], sizes = [1, 4], strides = [1, 1]} : vector<2x4xf32> to vector<1x4xf32>
    %121 = vector.broadcast %119 : vector<8x1xf32> to vector<8x4xf32>
    %122 = vector.broadcast %120 : vector<1x4xf32> to vector<8x4xf32>
    %123 = arith.mulf %121, %122 : vector<8x4xf32>
    %124 = arith.addf %118, %123 : vector<8x4xf32>
    %125 = vector.broadcast %1 : vector<1x4xf32> to vector<8x4xf32>
    %126 = arith.addf %124, %125 : vector<8x4xf32>
    %c0_75 = arith.constant 0 : index
    %c0_76 = arith.constant 0 : index
    %127 = vector.load %arg4[%c0_75, %c0_76] : memref<8x128xf32, #tpu.memory_space<vmem>>, vector<8x4xf32>
    tpu.vector_store %arg4[%c0_75, %c0_76], %126 {strides = array<i32>} : memref<8x128xf32, #tpu.memory_space<vmem>>, vector<8x4xf32>,
    %c0_77 = arith.constant 0 : index
    %c4 = arith.constant 4 : index
    %128 = vector.load %arg4[%c0_77, %c4] : memref<8x128xf32, #tpu.memory_space<vmem>>, vector<8x16xf32>
    tpu.vector_store %arg4[%c0_77, %c4], %112 {strides = array<i32>} : memref<8x128xf32, #tpu.memory_space<vmem>>, vector<8x16xf32>,
    %c0_78 = arith.constant 0 : index
    %c20 = arith.constant 20 : index
    %129 = vector.load %arg4[%c0_78, %c20] : memref<8x128xf32, #tpu.memory_space<vmem>>, vector<8x64xf32>
    tpu.vector_store %arg4[%c0_78, %c20], %110 {strides = array<i32>} : memref<8x128xf32, #tpu.memory_space<vmem>>, vector<8x64xf32>,
    %c0_79 = arith.constant 0 : index
    %c84 = arith.constant 84 : index
    %130 = vector.load %arg4[%c0_79, %c84] : memref<8x128xf32, #tpu.memory_space<vmem>>, vector<8x2xf32>
    tpu.vector_store %arg4[%c0_79, %c84], %113 {strides = array<i32>} : memref<8x128xf32, #tpu.memory_space<vmem>>, vector<8x2xf32>,
    %cst_80 = arith.constant 0.000000e+00 : f32
    %131 = vector.broadcast %cst_80 : f32 to vector<8x42xf32>
    %c0_81 = arith.constant 0 : index
    %c86 = arith.constant 86 : index
    %132 = vector.load %arg4[%c0_81, %c86] : memref<8x128xf32, #tpu.memory_space<vmem>>, vector<8x42xf32>
    tpu.vector_store %arg4[%c0_81, %c86], %131 {strides = array<i32>} : memref<8x128xf32, #tpu.memory_space<vmem>>, vector<8x42xf32>,
    %c8_82 = arith.constant 8 : index
    %c0_83 = arith.constant 0 : index
    %133 = vector.load %arg2[%c8_82, %c0_83] : memref<232x128xf32, #tpu.memory_space<vmem>>, vector<128x64xf32>
    %c3 = arith.constant 3 : index
    %c0_84 = arith.constant 0 : index
    %134 = vector.load %arg2[%c3, %c0_84] : memref<232x128xf32, #tpu.memory_space<vmem>>, vector<1x64xf32>
    %c136 = arith.constant 136 : index
    %c0_85 = arith.constant 0 : index
    %135 = vector.load %arg2[%c136, %c0_85] : memref<232x128xf32, #tpu.memory_space<vmem>>, vector<64x128xf32>
    %c4_86 = arith.constant 4 : index
    %c0_87 = arith.constant 0 : index
    %136 = vector.load %arg2[%c4_86, %c0_87] : memref<232x128xf32, #tpu.memory_space<vmem>>, vector<1x128xf32>
    %c0_88 = arith.constant 0 : index
    %c0_89 = arith.constant 0 : index
    %137 = vector.load %arg4[%c0_88, %c0_89] : memref<8x128xf32, #tpu.memory_space<vmem>>, vector<8x128xf32>
    %cst_90 = arith.constant dense<0.000000e+00> : vector<8x64xf32>
    %138 = tpu.matmul %137, %133, %cst_90 {dimension_numbers = #tpu.dot_dimension_numbers<[1], [0], [0], [1], [0, 0, 1, 1], [], []>} : vector<8x128xf32>, vector<128x64xf32>, vector<8x64xf32> -> vector<8x64xf32>
    %139 = vector.broadcast %134 : vector<1x64xf32> to vector<8x64xf32>
    %140 = arith.addf %138, %139 : vector<8x64xf32>
    %cst_91 = arith.constant 0.000000e+00 : f32
    %141 = vector.broadcast %cst_91 : f32 to vector<8x64xf32>
    %142 = arith.maximumf %140, %141 : vector<8x64xf32>
    %cst_92 = arith.constant dense<0.000000e+00> : vector<8x128xf32>
    %143 = tpu.matmul %142, %135, %cst_92 {dimension_numbers = #tpu.dot_dimension_numbers<[1], [0], [0], [1], [0, 0, 1, 1], [], []>} : vector<8x64xf32>, vector<64x128xf32>, vector<8x128xf32> -> vector<8x128xf32>
    %144 = vector.broadcast %136 : vector<1x128xf32> to vector<8x128xf32>
    %145 = arith.addf %143, %144 : vector<8x128xf32>
    %c0_93 = arith.constant 0 : index
    %c0_94 = arith.constant 0 : index
    %146 = vector.load %arg3[%c0_93, %c0_94] : memref<8x128xf32, #tpu.memory_space<vmem>>, vector<8x128xf32>
    tpu.vector_store %arg3[%c0_93, %c0_94], %145 {strides = array<i32>} : memref<8x128xf32, #tpu.memory_space<vmem>>, vector<8x128xf32>,
    return
  }
  func.func @transform_0(%arg0: i32) -> (i32, i32) {
    %c0_i32 = arith.constant 0 : i32
    %c0_i32_0 = arith.constant 0 : i32
    return %arg0, %c0_i32 : i32, i32
  }
  func.func @transform_1(%arg0: i32) -> (i32, i32) {
    %c0_i32 = arith.constant 0 : i32
    %c0_i32_0 = arith.constant 0 : i32
    %c0_i32_1 = arith.constant 0 : i32
    return %c0_i32, %c0_i32_0 : i32, i32
  }
  func.func @transform_2(%arg0: i32) -> (i32, i32) {
    %c0_i32 = arith.constant 0 : i32
    %c0_i32_0 = arith.constant 0 : i32
    return %arg0, %c0_i32 : i32, i32
  }
}

</mosaic_0001>

<bundles_post_ra>
// kernel: tpu_custom_call.1
= control target key start
LH: loop header
LB: loop body
LE: loop exit
PB: predicated region body
PF: predicated region fallthrough
CT: control target
= control target key end

     0   :  { %7 = vsyncpa [#allocation5], 0  ;;  %s2101_s0 = inlined_call_operand.vmem [shape: f32[64,2], index: 0, kind: input, shape index: {}]   ;;  %s2102_s1 = inlined_call_operand.hbm [shape: f32[232,128], index: 1, kind: input, shape index: {}]   ;;  %s2103_s2 = inlined_call_operand.hbm [shape: f32[8,128], index: 2, kind: output, shape index: {}]  }
   0x1   :  { %8 = vsyncpa [#allocation6], 0  ;;  %s1649_s9 = smov [#allocation4]   ;;  %s1601_s13 = scalar_lea.hbm %s2102_s1, 3712 }
   0x2   :  { %s16_s10 = sshll.u32 %s1649_s9, 4  ;;  %p1602_p0 = scmp.ne.s32.totalorder %s2102_s1, %s1601_s13  ;;  %s17_s10 = int_to_ptr.vmem [resolvable:$true] %s16_s10 }
   0x3   :  { %p1605_p1 = scmp.lt.u32.totalorder %s1601_s13, %s2102_s1 }
   0x5   :  { %p1607_p2 = pnand %p1605_p1, %p1602_p0 }
   0x7   :  { %1610 = shalt.err (!%p1607_p2)
}
   0x8   :  { %s1611_s18 = scalar_lea.vmem %s17_s10, 3712  ;;  %p1616_p4 = scmp.lt.s32.totalorder %s17_s10, %s17_s10 }
   0x9   :  { %p1612_p3 = scmp.ne.s32.totalorder %s17_s10, %s1611_s18  ;;  %p1617_p5 = scmp.lt.s32.totalorder %s1611_s18, %s1611_s18 }
   0xb   :  { %p1618_p6 = por %p1617_p5, %p1616_p4 }
   0xd   :  { %p1619_p7 = pnand %p1618_p6, %p1612_p3 }
   0xf   :  { %1622 = shalt.err (!%p1619_p7)
}
  0x10   :  { %s1650_s19 = smov 128   ;;  %s1651_s20 = smov 8  }
  0x11   :  { %22 = dma.hbm_to_vmem [thread:$0]  %s2102_s1, 3712, %s17_s10, [#allocation5], %s1650_s19, %s1650_s19, %s1651_s20  }
  0x12   :  { %1645 = dma.done.wait [#allocation5], 3712  }
  0x13   :  { %1646 = vsyncadd [#allocation5], 4294963584  ;;  %v1652_v0 = vmov 1   ;;  %v1653_v1 = vmov 0   ;;  %v32_v2 = vld [vmem:[%s2101_s0] sm:$0xff]  ;;  %v33_v3 = vld [vmem:[%s2101_s0 + $0x8] sm:$0xff]  ;;  %v80_v12 = vlaneseq }
  0x14   :  { %1598 = vset.pattern.permute.xlu1 %v1652_v0  ;;  %1597 = vset.pattern.permute.xlu0 %v1653_v1  ;;  %v34_v4 = vld [vmem:[%s2101_s0 + $0x10] sm:$0xff]  ;;  %v35_v5 = vld [vmem:[%s2101_s0 + $0x18] sm:$0xff]  ;;  %vm188_vm0 = vcmask 1043456   ;;  %v36_v7 = vld [vmem:[%s2101_s0 + $0x20] sm:$0xff]  ;;  %vm163_vm1 = vcmask 31744   ;;  %v1654_v57 = vmov 0.0  }
  0x15   :  { %93 = vperm.xlu1 %1598, %v32_v2   ;;  %42 = vperm.xlu0 %1597, %v32_v2   ;;  %v28_v6 = vld [vmem:[#allocation4 + $0xc8] sm:$0xf]  ;;  %v37_v8 = vld [vmem:[%s2101_s0 + $0x28] sm:$0xff]  ;;  %v1724_v11 = vld [vmem:[%s2101_s0 + $0x38] sm:$0xff]  ;;  %v81_v13 = vshrl.u32 %v80_v12, 7  ;;  %s1656_s10 = smov 112  }
  0x16   :  { %1418 = vmatprep.subr.msk.mxu0 %vm188_vm0, %v28_v6  ;;  %1576 = vmatprep.subr.msk.mxu1 %vm188_vm0, %v28_v6  ;;  %v38_v9 = vld [vmem:[%s2101_s0 + $0x30] sm:$0xff]  ;;  %v31_v10 = vld [vmem:[#allocation4 + $0xe0] sm:$0xf]  ;;  %s1655_s0 = smov 16   ;;  %vm369_vm2 = vcmask 130048   ;;  %s1657_s11 = smov 80  }
  0x17   :  { %1419 = vmatpush3.msk.msra.mxu0 %vm188_vm0, %v28_v6  ;;  %1577 = vmatpush3.msk.msra.mxu1 %vm188_vm0, %v28_v6  ;;  %v126_v14 = vsub.s32 1, %v81_v13  ;;  %v82_v15 = vsub.s32 0, %v81_v13  ;;  %v26_v16 = vld [vmem:[#allocation4] sm:$0x3]  ;;  %v1734_v23 = vld [vmem:[#allocation4 + $0x2] ss:$0 sm:$0xff] }
  0x18   :  { %1448 = vmatprep.subr.msk.mxu0 %vm188_vm0, %v31_v10  ;;  %s1658_s12 = smov 96   ;;  %s1659_s13 = smov 32   ;;  %vm933_vm3 = vcmask 523264   ;;  %vm966_vm4 = vcmask 1048064   ;;  %vm1007_vm5 = vcmask 654848   ;;  %vm1665_vm6 = vmmov 0  }
  0x19   :  { %97 = vperm.xlu1 %1598, %v33_v3   ;;  %47 = vperm.xlu0 %1597, %v33_v3   ;;  %v1728_v17 = vrot.slane %v26_v16, %v126_v14  ;;  %v1730_v18 = vrot.slane %v26_v16, %v82_v15  ;;  %s1660_s14 = smov 48   ;;  %s1661_s15 = smov 64   ;;  %vm1107_vm7 = vcmask 162848   ;;  %vm1113_vm8 = vcmask 687264  }
  0x1a   :  { %s1662_s16 = smov 84   ;;  %s1664_s17 = smov 68   ;;  %vm1118_vm9 = vcmask 704160   ;;  %vm1120_vm10 = vcmask 1048240  }
  0x1b   :  { %s1666_s18 = smov 20   ;;  %s1667_s19 = smov [#allocation7]  }
  0x1c   :  { %s1308_s20 = sshll.u32 %s1667_s19, 4  ;;  %s1309_s20 = int_to_ptr.vmem [resolvable:$true] %s1308_s20 }
  0x1d   :  { %101 = vperm.xlu1 %1598, %v34_v4   ;;  %52 = vperm.xlu0 %1597, %v34_v4   ;;  %s1623_s21 = scalar_lea.vmem %s1309_s20, 128  ;;  %p1628_p9 = scmp.lt.s32.totalorder %s1309_s20, %s1309_s20 }
  0x1e   :  { %p1624_p8 = scmp.ne.s32.totalorder %s1309_s20, %s1623_s21  ;;  %p1629_p10 = scmp.lt.s32.totalorder %s1623_s21, %s1623_s21 }
  0x20   :  { %p1630_p11 = por %p1629_p10, %p1628_p9 }
  0x21   :  { %105 = vperm.xlu1 %1598, %v35_v5   ;;  %57 = vperm.xlu0 %1597, %v35_v5  }
  0x22   :  { %p1631_p12 = pnand %p1630_p11, %p1624_p8 }
  0x25   :  { %109 = vperm.xlu1 %1598, %v36_v7   ;;  %62 = vperm.xlu0 %1597, %v36_v7  }
  0x29   :  { %113 = vperm.xlu1 %1598, %v37_v8   ;;  %67 = vperm.xlu0 %1597, %v37_v8  }
  0x2d   :  { %117 = vperm.xlu1 %1598, %v38_v9   ;;  %72 = vperm.xlu0 %1597, %v38_v9  }
  0x31   :  { %121 = vperm.xlu1 %1598, %v1724_v11   ;;  %77 = vperm.xlu0 %1597, %v1724_v11  }
  0x35   :  { %1599 = vset.pattern.permute.xlu1 %v1653_v1  ;;  %1600 = vset.pattern.permute.xlu0 %v1652_v0 }
  0x94   :  { %v94_v19 = vpop.permute.xlu1 %93  ;;  %v43_v20 = vpop.permute.xlu0 %42 }
  0x95   :  { %v128_v21 = vmul.f32 %v1728_v17, %v94_v19  ;;  %v84_v22 = vmul.f32 %v1730_v18, %v43_v20 }
  0x97   :  { %v136_v24 = vadd.f32 %v128_v21, %v84_v22 }
  0x98   :  { %v98_v25 = vpop.permute.xlu1 %97  ;;  %v48_v26 = vpop.permute.xlu0 %47 }
  0x99   :  { %v129_v27 = vmul.f32 %v1728_v17, %v98_v25  ;;  %v85_v28 = vmul.f32 %v1730_v18, %v48_v26  ;;  %v148_v29 = vadd.f32 %v1734_v23, %v136_v24 }
  0x9b   :  { %v137_v30 = vadd.f32 %v129_v27, %v85_v28  ;;  %1420 = vmatprep.mubr.msk.f32.mxu0 %vm163_vm1, %v148_v29 }
  0x9c   :  { %v102_v31 = vpop.permute.xlu1 %101  ;;  %v53_v32 = vpop.permute.xlu0 %52 }
  0x9d   :  { %v149_v33 = vadd.f32 %v1734_v23, %v137_v30  ;;  %v130_v34 = vmul.f32 %v1728_v17, %v102_v31  ;;  %v86_v35 = vmul.f32 %v1730_v18, %v53_v32 }
  0x9f   :  { %v138_v36 = vadd.f32 %v130_v34, %v86_v35  ;;  %v156_v37 = vsub.f32 %v149_v33, %v148_v29 }
  0xa0   :  { %v106_v38 = vpop.permute.xlu1 %105  ;;  %v58_v39 = vpop.permute.xlu0 %57 }
  0xa1   :  { %v150_v40 = vadd.f32 %v1734_v23, %v138_v36  ;;  %v131_v41 = vmul.f32 %v1728_v17, %v106_v38  ;;  %v87_v42 = vmul.f32 %v1730_v18, %v58_v39  ;;  %1421 = vmatmul.mubr.msk.f32.vlgmr.msra.gmra.mrb[0].mxu0 %vm163_vm1, %v156_v37 }
  0xa2   :  { %1449 = vmatpush3.msk.msra.mxu0 %vm188_vm0, %v31_v10 }
  0xa3   :  { %v139_v43 = vadd.f32 %v131_v41, %v87_v42  ;;  %v157_v44 = vsub.f32 %v150_v40, %v149_v33  ;;  %v30_v41 = vld [vmem:[#allocation4 + $0xd8] sm:$0xff] }
  0xa4   :  { %v110_v45 = vpop.permute.xlu1 %109  ;;  %v63_v46 = vpop.permute.xlu0 %62 }
  0xa5   :  { %v151_v47 = vadd.f32 %v1734_v23, %v139_v43  ;;  %v132_v48 = vmul.f32 %v1728_v17, %v110_v45  ;;  %v88_v49 = vmul.f32 %v1730_v18, %v63_v46  ;;  %1423 = vmatprep.mubr.msk.f32.mxu0 %vm163_vm1, %v157_v44 }
  0xa7   :  { %v140_v50 = vadd.f32 %v132_v48, %v88_v49  ;;  %v158_v51 = vsub.f32 %v151_v47, %v150_v40 }
  0xa8   :  { %v114_v52 = vpop.permute.xlu1 %113  ;;  %v68_v53 = vpop.permute.xlu0 %67 }
  0xa9   :  { %v152_v54 = vadd.f32 %v1734_v23, %v140_v50  ;;  %v133_v55 = vmul.f32 %v1728_v17, %v114_v52  ;;  %v89_v56 = vmul.f32 %v1730_v18, %v68_v53  ;;  %1424 = vmatmul.mubr.msk.f32.gmra.mrb[2].mxu0 %vm163_vm1, %v158_v51 }
  0xaa   :  { %1450 = vmatprep.mubr.f32.mxu0 %v1654_v57 }
  0xab   :  { %v141_v58 = vadd.f32 %v133_v55, %v89_v56  ;;  %v159_v59 = vsub.f32 %v152_v54, %v151_v47 }
  0xac   :  { %v118_v60 = vpop.permute.xlu1 %117  ;;  %v73_v61 = vpop.permute.xlu0 %72 }
  0xad   :  { %v153_v62 = vadd.f32 %v1734_v23, %v141_v58  ;;  %v134_v63 = vmul.f32 %v1728_v17, %v118_v60  ;;  %v90_v0 = vmul.f32 %v1730_v18, %v73_v61  ;;  %1426 = vmatprep.mubr.msk.f32.mxu1 %vm163_vm1, %v159_v59  ;;  %1451 = vmatmul.mubr.msk.f32.vlgmr.msra.gmra.mrb[4].mxu0 %vm163_vm1, %v148_v29 }
  0xae   :  { %1453 = vmatprep.mubr.msk.f32.mxu0 %vm163_vm1, %v149_v33 }
  0xaf   :  { %v142_v1 = vadd.f32 %v134_v63, %v90_v0  ;;  %v160_v2 = vsub.f32 %v153_v62, %v152_v54 }
  0xb0   :  { %v122_v3 = vpop.permute.xlu1 %121  ;;  %v78_v4 = vpop.permute.xlu0 %77 }
  0xb1   :  { %v154_v5 = vadd.f32 %v1734_v23, %v142_v1  ;;  %v135_v6 = vmul.f32 %v1728_v17, %v122_v3  ;;  %v91_v7 = vmul.f32 %v1730_v18, %v78_v4  ;;  %1427 = vmatmul.mubr.msk.f32.vlgmr.msra.gmra.mrb[0].mxu1 %vm163_vm1, %v160_v2  ;;  %1454 = vmatmul.mubr.msk.f32.gmra.mrb[6].mxu0 %vm163_vm1, %v150_v40  ;;  %v29_v40 = vld [vmem:[#allocation4 + $0xd0] sm:$0xff] }
  0xb2   :  { %1456 = vmatprep.mubr.msk.f32.mxu0 %vm163_vm1, %v151_v47  ;;  %v1532_v42 = vpack.c.bf16 %v30_v41, %v29_v40 }
  0xb3   :  { %v143_v8 = vadd.f32 %v135_v6, %v91_v7  ;;  %v161_v9 = vsub.f32 %v154_v5, %v153_v62 }
  0xb4   :  { %1533 = vmatprep.subr.bf16.mxu1 %v1532_v42 }
  0xb5   :  { %v155_v10 = vadd.f32 %v1734_v23, %v143_v8  ;;  %1429 = vmatprep.mubr.msk.f32.mxu1 %vm163_vm1, %v161_v9  ;;  %1457 = vmatmul.mubr.msk.f32.gmra.mrb[8].mxu0 %vm163_vm1, %v152_v54 }
  0xb6   :  { %1459 = vmatprep.mubr.msk.f32.mxu0 %vm163_vm1, %v153_v62  ;;  %1535 = vmatpush3.bf16.msra.mxu1 %v1532_v42 }
  0xb7   :  { %v162_v12 = vsub.f32 %v155_v10, %v154_v5  ;;  %1537 = vmatprep.subr.bf16.mxu1 %v1532_v42 }
  0xb9   :  { %1430 = vmatmul.mubr.msk.f32.gmra.mrb[2].mxu1 %vm163_vm1, %v162_v12  ;;  %1460 = vmatmul.mubr.msk.f32.gmra.mrb[10].mxu0 %vm163_vm1, %v154_v5 }
  0xba   :  { %1510 = vmatprep.mubr.msk.f32.mxu0 %vm1665_vm6, %v1654_v57 }
 0x174   :  { %v1775_v13 = vpop.f32.mrb[0].mxu0 }
 0x175   :  { %315 = vrot.lane.b32.xlu1 %v1775_v13, %s1655_s0  ;;  %v1779_v14 = vpop.f32.mrb[1].mxu0  ;;  %v298_v43 = vmul.f32 0.5, %v1775_v13 }
 0x176   :  { %313 = vrot.lane.b32.xlu0 %v1779_v14, %s1655_s0  ;;  %v297_v45 = vmul.f32 0.5, %v1779_v14 }
 0x17c   :  { %v1783_v15 = vpop.f32.mrb[2].mxu0 }
 0x17d   :  { %319 = vrot.lane.b32.xlu1 %v1783_v15, %s1655_s0  ;;  %v1787_v16 = vpop.f32.mrb[3].mxu0  ;;  %v300_v49 = vmul.f32 0.5, %v1783_v15 }
 0x17e   :  { %317 = vrot.lane.b32.xlu0 %v1787_v16, %s1655_s0  ;;  %v299_v51 = vmul.f32 0.5, %v1787_v16 }
 0x180   :  { %v1791_v19 = vpop.f32.mrb[4].mxu0 }
 0x181   :  { %v661_v20 = vmul.f32 %v1791_v19, %v1775_v13  ;;  %v1795_v21 = vpop.f32.mrb[5].mxu0 }
 0x182   :  { %v660_v22 = vmul.f32 %v1795_v21, %v1779_v14 }
 0x184   :  { %v1799_v24 = vpop.f32.mrb[0].mxu1  ;;  %v1801_v25 = vpop.f32.mrb[6].mxu0 }
 0x185   :  { %v663_v26 = vmul.f32 %v1801_v25, %v1783_v15  ;;  %v1805_v27 = vpop.f32.mrb[1].mxu1  ;;  %323 = vrot.lane.b32.xlu1 %v1799_v24, %s1655_s0  ;;  %v1809_v28 = vpop.f32.mrb[7].mxu0  ;;  %v302_v55 = vmul.f32 0.5, %v1799_v24 }
 0x186   :  { %v662_v29 = vmul.f32 %v1809_v28, %v1787_v16  ;;  %321 = vrot.lane.b32.xlu0 %v1805_v27, %s1655_s0  ;;  %v301_v58 = vmul.f32 0.5, %v1805_v27 }
 0x188   :  { %v1815_v30 = vpop.f32.mrb[8].mxu0 }
 0x189   :  { %v665_v31 = vmul.f32 %v1815_v30, %v1799_v24  ;;  %v1819_v32 = vpop.f32.mrb[9].mxu0 }
 0x18a   :  { %v664_v33 = vmul.f32 %v1819_v32, %v1805_v27 }
 0x18c   :  { %v1823_v34 = vpop.f32.mrb[2].mxu1  ;;  %v1825_v35 = vpop.f32.mrb[10].mxu0 }
 0x18d   :  { %v667_v36 = vmul.f32 %v1825_v35, %v1823_v34  ;;  %v1829_v37 = vpop.f32.mrb[3].mxu1  ;;  %327 = vrot.lane.b32.xlu1 %v1823_v34, %s1655_s0  ;;  %v1833_v38 = vpop.f32.mrb[11].mxu0  ;;  %v304_v62 = vmul.f32 0.5, %v1823_v34 }
 0x18e   :  { %v666_v39 = vmul.f32 %v1833_v38, %v1829_v37  ;;  %325 = vrot.lane.b32.xlu0 %v1829_v37, %s1655_s0  ;;  %v303_v0 = vmul.f32 0.5, %v1829_v37 }
 0x1e7   :  { %v316_v44 = vpop.permute.xlu1 %315 }
 0x1e8   :  { %v338_v46 = vmul.f32 %v316_v44, %v298_v43  ;;  %v314_v47 = vpop.permute.xlu0 %313 }
 0x1e9   :  { %v337_v48 = vmul.f32 %v314_v47, %v297_v45 }
 0x1ea   :  { %355 = vrot.lane.b32.xlu1 %v338_v46, %s1656_s10 }
 0x1eb   :  { %353 = vrot.lane.b32.xlu0 %v337_v48, %s1656_s10 }
 0x1ef   :  { %v320_v50 = vpop.permute.xlu1 %319 }
 0x1f0   :  { %v340_v52 = vmul.f32 %v320_v50, %v300_v49  ;;  %v318_v53 = vpop.permute.xlu0 %317 }
 0x1f1   :  { %v339_v54 = vmul.f32 %v318_v53, %v299_v51 }
 0x1f2   :  { %359 = vrot.lane.b32.xlu1 %v340_v52, %s1656_s10 }
 0x1f3   :  { %357 = vrot.lane.b32.xlu0 %v339_v54, %s1656_s10 }
 0x1f7   :  { %v324_v56 = vpop.permute.xlu1 %323 }
 0x1f8   :  { %v342_v59 = vmul.f32 %v324_v56, %v302_v55  ;;  %v322_v60 = vpop.permute.xlu0 %321 }
 0x1f9   :  { %v341_v61 = vmul.f32 %v322_v60, %v301_v58 }
 0x1fa   :  { %363 = vrot.lane.b32.xlu1 %v342_v59, %s1656_s10 }
 0x1fb   :  { %361 = vrot.lane.b32.xlu0 %v341_v61, %s1656_s10 }
 0x1ff   :  { %v328_v63 = vpop.permute.xlu1 %327 }
 0x200   :  { %v344_v1 = vmul.f32 %v328_v63, %v304_v62  ;;  %v326_v2 = vpop.permute.xlu0 %325 }
 0x201   :  { %v343_v3 = vmul.f32 %v326_v2, %v303_v0 }
 0x202   :  { %367 = vrot.lane.b32.xlu1 %v344_v1, %s1656_s10 }
 0x203   :  { %365 = vrot.lane.b32.xlu0 %v343_v3, %s1656_s10 }
 0x206   :  { %678 = vrot.lane.b32.xlu1 %v661_v20, %s1655_s0 }
 0x207   :  { %676 = vrot.lane.b32.xlu0 %v660_v22, %s1655_s0 }
 0x20a   :  { %682 = vrot.lane.b32.xlu1 %v663_v26, %s1655_s0 }
 0x20b   :  { %680 = vrot.lane.b32.xlu0 %v662_v29, %s1655_s0 }
 0x20e   :  { %686 = vrot.lane.b32.xlu1 %v665_v31, %s1655_s0 }
 0x20f   :  { %684 = vrot.lane.b32.xlu0 %v664_v33, %s1655_s0 }
 0x212   :  { %690 = vrot.lane.b32.xlu1 %v667_v36, %s1655_s0 }
 0x213   :  { %688 = vrot.lane.b32.xlu0 %v666_v39, %s1655_s0 }
 0x25c   :  { %v356_v5 = vpop.permute.xlu1 %355 }
 0x25d   :  { %v354_v4 = vpop.permute.xlu0 %353 }
 0x25e   :  { %1436 = vmatprep.mubr.msk.f32.mxu1 %vm369_vm2, %v354_v4 }
 0x25f   :  { %1437 = vmatmul.mubr.msk.f32.vlgmr.msra.gmra.mrb[4].mxu1 %vm369_vm2, %v356_v5 }
 0x260   :  { %1539 = vmatpush3.bf16.msra.mxu1 %v1532_v42 }
 0x264   :  { %v360_v7 = vpop.permute.xlu1 %359 }
 0x265   :  { %v358_v6 = vpop.permute.xlu0 %357 }
 0x266   :  { %1439 = vmatprep.mubr.msk.f32.mxu1 %vm369_vm2, %v358_v6 }
 0x267   :  { %1440 = vmatmul.mubr.msk.f32.gmra.mrb[6].mxu1 %vm369_vm2, %v360_v7 }
 0x26c   :  { %v364_v9 = vpop.permute.xlu1 %363 }
 0x26d   :  { %v362_v8 = vpop.permute.xlu0 %361 }
 0x26e   :  { %1442 = vmatprep.mubr.msk.f32.mxu1 %vm369_vm2, %v362_v8 }
 0x26f   :  { %1443 = vmatmul.mubr.msk.f32.gmra.mrb[8].mxu1 %vm369_vm2, %v364_v9 }
 0x274   :  { %v368_v10 = vpop.permute.xlu1 %367 }
 0x275   :  { %v366_v12 = vpop.permute.xlu0 %365 }
 0x276   :  { %1445 = vmatprep.mubr.msk.f32.mxu1 %vm369_vm2, %v366_v12 }
 0x277   :  { %1446 = vmatmul.mubr.msk.f32.gmra.mrb[10].mxu1 %vm369_vm2, %v368_v10 }
 0x278   :  { %v679_v20 = vpop.permute.xlu1 %678 }
 0x279   :  { %v1871_v22 = vadd.f32 %v679_v20, %v338_v46  ;;  %v677_v26 = vpop.permute.xlu0 %676 }
 0x27a   :  { %v1873_v29 = vadd.f32 %v677_v26, %v337_v48 }
 0x27b   :  { %718 = vrot.lane.b32.xlu1 %v1871_v22, %s1656_s10 }
 0x27c   :  { %v683_v31 = vpop.permute.xlu1 %682  ;;  %716 = vrot.lane.b32.xlu0 %v1873_v29, %s1656_s10 }
 0x27d   :  { %v1879_v33 = vadd.f32 %v683_v31, %v340_v52  ;;  %v681_v36 = vpop.permute.xlu0 %680 }
 0x27e   :  { %v1881_v39 = vadd.f32 %v681_v36, %v339_v54 }
 0x27f   :  { %722 = vrot.lane.b32.xlu1 %v1879_v33, %s1656_s10 }
 0x280   :  { %v687_v40 = vpop.permute.xlu1 %686  ;;  %720 = vrot.lane.b32.xlu0 %v1881_v39, %s1656_s10 }
 0x281   :  { %v1887_v41 = vadd.f32 %v687_v40, %v342_v59  ;;  %v685_v42 = vpop.permute.xlu0 %684 }
 0x282   :  { %v1889_v43 = vadd.f32 %v685_v42, %v341_v61 }
 0x283   :  { %726 = vrot.lane.b32.xlu1 %v1887_v41, %s1656_s10 }
 0x284   :  { %v691_v44 = vpop.permute.xlu1 %690  ;;  %724 = vrot.lane.b32.xlu0 %v1889_v43, %s1656_s10 }
 0x285   :  { %v1895_v45 = vadd.f32 %v691_v44, %v344_v1  ;;  %v689_v46 = vpop.permute.xlu0 %688 }
 0x286   :  { %v1897_v47 = vadd.f32 %v689_v46, %v343_v3 }
 0x287   :  { %730 = vrot.lane.b32.xlu1 %v1895_v45, %s1656_s10 }
 0x288   :  { %728 = vrot.lane.b32.xlu0 %v1897_v47, %s1656_s10 }
 0x2ed   :  { %v719_v48 = vpop.permute.xlu1 %718 }
 0x2ee   :  { %v717_v49 = vpop.permute.xlu0 %716 }
 0x2ef   :  { %1466 = vmatprep.mubr.msk.f32.mxu1 %vm369_vm2, %v717_v49 }
 0x2f0   :  { %1467 = vmatmul.mubr.msk.f32.vlgmr.msra.gmra.mrb[12].mxu1 %vm369_vm2, %v719_v48 }
 0x2f1   :  { %v723_v50 = vpop.permute.xlu1 %722 }
 0x2f2   :  { %v721_v51 = vpop.permute.xlu0 %720 }
 0x2f3   :  { %1469 = vmatprep.mubr.msk.f32.mxu1 %vm369_vm2, %v721_v51 }
 0x2f4   :  { %1470 = vmatmul.mubr.msk.f32.gmra.mrb[14].mxu1 %vm369_vm2, %v723_v50 }
 0x2f5   :  { %v727_v52 = vpop.permute.xlu1 %726 }
 0x2f6   :  { %v725_v53 = vpop.permute.xlu0 %724 }
 0x2f7   :  { %1472 = vmatprep.mubr.msk.f32.mxu1 %vm369_vm2, %v725_v53 }
 0x2f8   :  { %1473 = vmatmul.mubr.msk.f32.gmra.mrb[16].mxu1 %vm369_vm2, %v727_v52 }
 0x2f9   :  { %v731_v55 = vpop.permute.xlu1 %730 }
 0x2fa   :  { %v729_v54 = vpop.permute.xlu0 %728 }
 0x2fb   :  { %1475 = vmatprep.mubr.msk.f32.mxu1 %vm369_vm2, %v729_v54 }
 0x2fc   :  { %1476 = vmatmul.mubr.msk.f32.gmra.mrb[18].mxu1 %vm369_vm2, %v731_v55 }
 0x2fd   :  { %1529 = vmatprep.mubr.msk.f32.mxu1 %vm1665_vm6, %v1654_v57 }
 0x332   :  { %v1911_v56 = vpop.f32.mrb[4].mxu1 }
 0x333   :  { %v1913_v58 = vpop.f32.mrb[5].mxu1  ;;  %863 = vrot.lane.b32.xlu0 %v1911_v56, %s1657_s11  ;;  %v492_v26 = vmul.f32 0.33333334, %v1911_v56 }
 0x33a   :  { %v1916_v59 = vpop.f32.mrb[6].mxu1 }
 0x33b   :  { %v1918_v60 = vpop.f32.mrb[7].mxu1  ;;  %867 = vrot.lane.b32.xlu0 %v1916_v59, %s1657_s11  ;;  %v494_v40 = vmul.f32 0.33333334, %v1916_v59 }
 0x33c   :  { %865 = vrot.lane.b32.xlu1 %v1918_v60, %s1657_s11  ;;  %v493_v42 = vmul.f32 0.33333334, %v1918_v60 }
 0x342   :  { %v1922_v61 = vpop.f32.mrb[8].mxu1 }
 0x343   :  { %v1924_v62 = vpop.f32.mrb[9].mxu1  ;;  %871 = vrot.lane.b32.xlu0 %v1922_v61, %s1657_s11  ;;  %v496_v50 = vmul.f32 0.33333334, %v1922_v61 }
 0x344   :  { %869 = vrot.lane.b32.xlu1 %v1924_v62, %s1657_s11  ;;  %v495_v52 = vmul.f32 0.33333334, %v1924_v62 }
 0x34a   :  { %v1928_v63 = vpop.f32.mrb[10].mxu1 }
 0x34b   :  { %v1930_v0 = vpop.f32.mrb[11].mxu1  ;;  %875 = vrot.lane.b32.xlu0 %v1928_v63, %s1657_s11 }
 0x34c   :  { %873 = vrot.lane.b32.xlu1 %v1930_v0, %s1657_s11  ;;  %v497_v62 = vmul.f32 0.33333334, %v1930_v0 }
 0x34f   :  { %861 = vrot.lane.b32.xlu0 %v1913_v58, %s1657_s11 }
 0x350   :  { %501 = vrot.lane.b32.xlu1 %v1775_v13, %s1658_s12 }
 0x353   :  { %503 = vrot.lane.b32.xlu0 %v1787_v16, %s1658_s12 }
 0x354   :  { %944 = vrot.lane.b32.xlu1 %v1775_v13, %s1659_s13 }
 0x357   :  { %946 = vrot.lane.b32.xlu0 %v1787_v16, %s1659_s13 }
 0x358   :  { %505 = vrot.lane.b32.xlu1 %v1783_v15, %s1658_s12 }
 0x35b   :  { %507 = vrot.lane.b32.xlu0 %v1805_v27, %s1658_s12 }
 0x35c   :  { %948 = vrot.lane.b32.xlu1 %v1783_v15, %s1659_s13 }
 0x3a5   :  { %v864_v1 = vpop.permute.xlu0 %863 }
 0x3a6   :  { %v886_v2 = vmul.f32 %v1791_v19, %v864_v1 }
 0x3a8   :  { %903 = vrot.lane.b32.xlu1 %v886_v2, %s1656_s10 }
 0x3ac   :  { %509 = vrot.lane.b32.xlu1 %v1799_v24, %s1658_s12 }
 0x3ad   :  { %v868_v13 = vpop.permute.xlu0 %867 }
 0x3ae   :  { %v888_v16 = vmul.f32 %v1801_v25, %v868_v13  ;;  %v866_v3 = vpop.permute.xlu1 %865 }
 0x3af   :  { %v887_v4 = vmul.f32 %v866_v3, %v1809_v28 }
 0x3b0   :  { %907 = vrot.lane.b32.xlu1 %v888_v16, %s1656_s10 }
 0x3b1   :  { %905 = vrot.lane.b32.xlu0 %v887_v4, %s1656_s10  ;;  %v498_v4 = vmul.f32 0.33333334, %v1928_v63 }
 0x3b5   :  { %950 = vrot.lane.b32.xlu0 %v1805_v27, %s1659_s13  ;;  %v872_v15 = vpop.permute.xlu0 %871 }
 0x3b6   :  { %v890_v19 = vmul.f32 %v1815_v30, %v872_v15  ;;  %v870_v5 = vpop.permute.xlu1 %869 }
 0x3b7   :  { %v889_v6 = vmul.f32 %v870_v5, %v1819_v32 }
 0x3b8   :  { %911 = vrot.lane.b32.xlu1 %v890_v19, %s1656_s10 }
 0x3b9   :  { %909 = vrot.lane.b32.xlu0 %v889_v6, %s1656_s10 }
 0x3bc   :  { %952 = vrot.lane.b32.xlu1 %v1799_v24, %s1659_s13 }
 0x3bd   :  { %511 = vrot.lane.b32.xlu0 %v1829_v37, %s1658_s12  ;;  %v876_v28 = vpop.permute.xlu0 %875 }
 0x3be   :  { %v874_v25 = vpop.permute.xlu1 %873  ;;  %v892_v30 = vmul.f32 %v1825_v35, %v876_v28 }
 0x3bf   :  { %v891_v27 = vmul.f32 %v874_v25, %v1833_v38 }
 0x3c0   :  { %513 = vrot.lane.b32.xlu1 %v1823_v34, %s1658_s12 }
 0x3c1   :  { %913 = vrot.lane.b32.xlu0 %v891_v27, %s1656_s10  ;;  %v862_v38 = vpop.permute.xlu0 %861 }
 0x3c2   :  { %v885_v35 = vmul.f32 %v862_v38, %v1795_v21 }
 0x3c3   :  { %v1468_v32 = vpop.f32.mrb[12].mxu1 }
 0x3c4   :  { %976 = vst.msk [vmem:[#allocation3 + $0x18] sm:$0xff] %vm933_vm3, %v1468_v32  ;;  %v814_v7 = vpop.f32.mrb[13].mxu1  ;;  %915 = vrot.lane.b32.xlu1 %v892_v30, %s1656_s10  ;;  %v491_v32 = vmul.f32 0.33333334, %v1913_v58 }
 0x3c5   :  { %975 = vst.msk [vmem:[#allocation3 + $0x8] sm:$0xff] %vm933_vm3, %v814_v7  ;;  %954 = vrot.lane.b32.xlu0 %v1829_v37, %s1659_s13  ;;  %v504_v20 = vpop.permute.xlu0 %503 }
 0x3c6   :  { %v525_v44 = vmul.f32 %v504_v20, %v493_v42  ;;  %v1125_v42 = vld [vmem:[#allocation4 + $0x20] sm:$0xff] }
 0x3c7   :  { %v1471_v24 = vpop.f32.mrb[14].mxu1 }
 0x3c8   :  { %978 = vst.msk [vmem:[#allocation3 + $0x38] sm:$0xff] %vm933_vm3, %v1471_v24  ;;  %v824_v8 = vpop.f32.mrb[15].mxu1  ;;  %499 = vrot.lane.b32.xlu1 %v1779_v14, %s1658_s12 }
 0x3c9   :  { %977 = vst.msk [vmem:[#allocation3 + $0x28] sm:$0xff] %vm933_vm3, %v824_v8  ;;  %956 = vrot.lane.b32.xlu0 %v1823_v34, %s1659_s13  ;;  %v947_v31 = vpop.permute.xlu0 %946 }
 0x3cb   :  { %v1474_v9 = vpop.f32.mrb[16].mxu1 }
 0x3cc   :  { %980 = vst.msk [vmem:[#allocation3 + $0x58] sm:$0xff] %vm933_vm3, %v1474_v9  ;;  %v834_v10 = vpop.f32.mrb[17].mxu1  ;;  %942 = vrot.lane.b32.xlu1 %v1779_v14, %s1659_s13  ;;  %v502_v14 = vpop.permute.xlu1 %501 }
 0x3cd   :  { %979 = vst.msk [vmem:[#allocation3 + $0x48] sm:$0xff] %vm933_vm3, %v834_v10  ;;  %901 = vrot.lane.b32.xlu0 %v885_v35, %s1656_s10 }
 0x3cf   :  { %v1477_v37 = vpop.f32.mrb[18].mxu1 }
 0x3d0   :  { %982 = vst.msk [vmem:[#allocation3 + $0x78] sm:$0xff] %vm933_vm3, %v1477_v37  ;;  %v844_v12 = vpop.f32.mrb[19].mxu1  ;;  %985 = vrot.lane.b32.xlu1 %v1871_v22, %s1660_s14  ;;  %v945_v21 = vpop.permute.xlu1 %944 }
 0x3d1   :  { %981 = vst.msk [vmem:[#allocation3 + $0x68] sm:$0xff] %vm933_vm3, %v844_v12  ;;  %983 = vrot.lane.b32.xlu0 %v1873_v29, %s1660_s14  ;;  %v524_v29 = vmul.f32 %v502_v14, %v492_v26 }
 0x3d4   :  { %v506_v34 = vpop.permute.xlu1 %505 }
 0x3d5   :  { %987 = vrot.lane.b32.xlu0 %v1881_v39, %s1660_s14 }
 0x3d8   :  { %v949_v22 = vpop.permute.xlu1 %948 }
 0x3d9   :  { %989 = vrot.lane.b32.xlu0 %v1879_v33, %s1660_s14 }
 0x3dd   :  { %991 = vrot.lane.b32.xlu0 %v1889_v43, %s1660_s14  ;;  %v526_v43 = vmul.f32 %v506_v34, %v494_v40 }
 0x3e1   :  { %993 = vrot.lane.b32.xlu0 %v1887_v41, %s1660_s14  ;;  %v508_v41 = vpop.permute.xlu0 %507 }
 0x3e2   :  { %v527_v54 = vmul.f32 %v508_v41, %v495_v52  ;;  %v1663_v41 = vmov 0.0|0.0  }
 0x3e3   :  { %1540 = vmatprep.subr.bf16.mxu0 %v1663_v41  ;;  %1564 = vmatprep.subr.bf16.mxu1 %v1663_v41 }
 0x3e5   :  { %995 = vrot.lane.b32.xlu0 %v1897_v47, %s1660_s14 }
 0x3e9   :  { %997 = vrot.lane.b32.xlu0 %v1895_v45, %s1660_s14 }
 0x41a   :  { %v904_v36 = vpop.permute.xlu1 %903 }
 0x41b   :  { %v926_v33 = vadd.f32 %v904_v36, %v524_v29  ;;  %v1122_v36 = vld [vmem:[#allocation4 + $0x8] sm:$0xff] }
 0x41d   :  { %935 = vst.msk [vmem:[#allocation3 + $0x10] sm:$0xff] %vm933_vm3, %v926_v33  ;;  %v1123_v33 = vld [vmem:[#allocation4 + $0x10] sm:$0xff] }
 0x41e   :  { %968 = vst.msk [vmem:[#allocation3 + $0x10] sm:$0xff] %vm966_vm4, %v945_v21  ;;  %v510_v39 = vpop.permute.xlu1 %509 }
 0x41f   :  { %v528_v53 = vmul.f32 %v510_v39, %v496_v50  ;;  %v1124_v39 = vld [vmem:[#allocation4 + $0x18] sm:$0xff]  ;;  %v1127_v50 = vld [vmem:[#allocation4 + $0x30] sm:$0xff] }
 0x422   :  { %v908_v45 = vpop.permute.xlu1 %907 }
 0x423   :  { %v928_v46 = vadd.f32 %v908_v45, %v526_v43  ;;  %v906_v47 = vpop.permute.xlu0 %905 }
 0x424   :  { %v927_v48 = vadd.f32 %v906_v47, %v525_v44 }
 0x425   :  { %937 = vst.msk [vmem:[#allocation3 + $0x30] sm:$0xff] %vm933_vm3, %v928_v46  ;;  %v2005_v49 = vld [vmem:[#allocation3 + $0x10] sm:$0xff]  ;;  %v1544_v46 = vpack.c.bf16 %v1125_v42, %v1124_v39 }
 0x426   :  { %970 = vst.msk [vmem:[#allocation3 + $0x30] sm:$0xff] %vm966_vm4, %v949_v22  ;;  %1021 = vrot.lane.b32.xlu1 %v2005_v49, %s1661_s15 }
 0x427   :  { %936 = vst.msk [vmem:[#allocation3 + $0x20] sm:$0xff] %vm933_vm3, %v927_v48  ;;  %v951_v51 = vpop.permute.xlu0 %950  ;;  %v1126_v48 = vld [vmem:[#allocation4 + $0x28] sm:$0xff] }
 0x428   :  { %969 = vst.msk [vmem:[#allocation3 + $0x20] sm:$0xff] %vm966_vm4, %v947_v31 }
 0x42a   :  { %v912_v55 = vpop.permute.xlu1 %911 }
 0x42b   :  { %v930_v56 = vadd.f32 %v912_v55, %v528_v53  ;;  %v910_v59 = vpop.permute.xlu0 %909  ;;  %v1128_v55 = vld [vmem:[#allocation4 + $0x38] sm:$0xff] }
 0x42c   :  { %v929_v60 = vadd.f32 %v910_v59, %v527_v54  ;;  %v1547_v54 = vpack.c.bf16 %v1127_v50, %v1126_v48  ;;  %v1142_v48 = vld [vmem:[#allocation4 + $0xa0] sm:$0xff]  ;;  %v1143_v50 = vld [vmem:[#allocation4 + $0xa8] sm:$0xff] }
 0x42d   :  { %939 = vst.msk [vmem:[#allocation3 + $0x50] sm:$0xff] %vm933_vm3, %v930_v56  ;;  %v2023_v3 = vld [vmem:[#allocation3 + $0x30] sm:$0xff]  ;;  %v1129_v56 = vld [vmem:[#allocation4 + $0x40] sm:$0xff] }
 0x42e   :  { %938 = vst.msk [vmem:[#allocation3 + $0x40] sm:$0xff] %vm933_vm3, %v929_v60  ;;  %v953_v1 = vpop.permute.xlu1 %952 }
 0x42f   :  { %v2016_v2 = vld [vmem:[#allocation3 + $0x20] sm:$0xff]  ;;  %971 = vst.msk [vmem:[#allocation3 + $0x40] sm:$0xff] %vm966_vm4, %v951_v51  ;;  %972 = vst.msk [vmem:[#allocation3 + $0x50] sm:$0xff] %vm966_vm4, %v953_v1  ;;  %v512_v61 = vpop.permute.xlu0 %511 }
 0x430   :  { %1031 = vrot.lane.b32.xlu1 %v2016_v2, %s1661_s15  ;;  %v529_v13 = vmul.f32 %v512_v61, %v497_v62  ;;  %v1550_v61 = vpack.c.bf16 %v1129_v56, %v1128_v55  ;;  %v1130_v62 = vld [vmem:[#allocation4 + $0x48] sm:$0xff] }
 0x432   :  { %v514_v16 = vpop.permute.xlu1 %513 }
 0x433   :  { %v914_v15 = vpop.permute.xlu0 %913  ;;  %v530_v5 = vmul.f32 %v514_v16, %v498_v4  ;;  %v1132_v4 = vld [vmem:[#allocation4 + $0x58] sm:$0xff] }
 0x434   :  { %1041 = vrot.lane.b32.xlu1 %v2023_v3, %s1661_s15  ;;  %v931_v19 = vadd.f32 %v914_v15, %v529_v13  ;;  %v1131_v13 = vld [vmem:[#allocation4 + $0x50] sm:$0xff]  ;;  %v1133_v15 = vld [vmem:[#allocation4 + $0x60] sm:$0xff] }
 0x435   :  { %v1553_v16 = vpack.c.bf16 %v1131_v13, %v1130_v62 }
 0x436   :  { %940 = vst.msk [vmem:[#allocation3 + $0x60] sm:$0xff] %vm933_vm3, %v931_v19  ;;  %v916_v6 = vpop.permute.xlu1 %915  ;;  %v2029_v25 = vld [vmem:[#allocation3 + $0x40] sm:$0xff]  ;;  %v2035_v27 = vld [vmem:[#allocation3 + $0x50] sm:$0xff]  ;;  %v1556_v19 = vpack.c.bf16 %v1133_v15, %v1132_v4 }
 0x437   :  { %v932_v28 = vadd.f32 %v916_v6, %v530_v5  ;;  %v955_v0 = vpop.permute.xlu0 %954 }
 0x438   :  { %1051 = vrot.lane.b32.xlu1 %v2029_v25, %s1661_s15  ;;  %973 = vst.msk [vmem:[#allocation3 + $0x60] sm:$0xff] %vm966_vm4, %v955_v0 }
 0x439   :  { %941 = vst.msk [vmem:[#allocation3 + $0x70] sm:$0xff] %vm933_vm3, %v932_v28 }
 0x43a   :  { %v500_v63 = vpop.permute.xlu1 %499 }
 0x43b   :  { %v957_v30 = vpop.permute.xlu0 %956  ;;  %v523_v7 = vmul.f32 %v500_v63, %v491_v32 }
 0x43c   :  { %1061 = vrot.lane.b32.xlu1 %v2035_v27, %s1661_s15  ;;  %974 = vst.msk [vmem:[#allocation3 + $0x70] sm:$0xff] %vm966_vm4, %v957_v30 }
 0x43e   :  { %v943_v24 = vpop.permute.xlu1 %942 }
 0x43f   :  { %v902_v38 = vpop.permute.xlu0 %901  ;;  %v2041_v8 = vld [vmem:[#allocation3 + $0x60] sm:$0xff] }
 0x440   :  { %v925_v35 = vadd.f32 %v902_v38, %v523_v7  ;;  %1071 = vrot.lane.b32.xlu1 %v2041_v8, %s1661_s15 }
 0x442   :  { %934 = vst.msk [vmem:[#allocation3] sm:$0xff] %vm933_vm3, %v925_v35  ;;  %v986_v9 = vpop.permute.xlu1 %985 }
 0x443   :  { %967 = vst.msk [vmem:[#allocation3] sm:$0xff] %vm966_vm4, %v943_v24  ;;  %v984_v58 = vpop.permute.xlu0 %983  ;;  %v2048_v10 = vld [vmem:[#allocation3 + $0x70] sm:$0xff] }
 0x444   :  { %1009 = vst.msk [vmem:[#allocation3 + $0x18] sm:$0xff] %vm1007_vm5, %v986_v9  ;;  %1008 = vst.msk [vmem:[#allocation3 + $0x8] sm:$0xff] %vm1007_vm5, %v984_v58  ;;  %1081 = vrot.lane.b32.xlu0 %v2048_v10, %s1661_s15  ;;  %1091 = vperm.xlu1 %1599, %v1724_v11  }
 0x447   :  { %v988_v37 = vpop.permute.xlu0 %987 }
 0x448   :  { %1010 = vst.msk [vmem:[#allocation3 + $0x28] sm:$0xff] %vm1007_vm5, %v988_v37  ;;  %1096 = vperm.xlu0 %1600, %v1724_v11  }
 0x44a   :  { %v1016_v6 = vld [vmem:[#allocation3] sm:$0xff] }
 0x44b   :  { %v990_v12 = vpop.permute.xlu0 %989  ;;  %v1017_v34 = vld [vmem:[#allocation3 + $0x8] sm:$0xff]  ;;  %v1026_v20 = vld [vmem:[#allocation3 + $0x18] sm:$0xff]  ;;  %v1019_v0 = vadd.f32 %v2005_v49, %v1016_v6 }
 0x44c   :  { %1011 = vst.msk [vmem:[#allocation3 + $0x38] sm:$0xff] %vm1007_vm5, %v990_v12  ;;  %1115 = vrot.lane.b32.xlu0 %v1724_v11, %s1662_s16  ;;  %v1027_v29 = vadd.f32 %v1026_v20, %v1017_v34  ;;  %v1541_v11 = vpack.c.bf16 %v1123_v33, %v1122_v36  ;;  %v1137_v36 = vld [vmem:[#allocation4 + $0x80] sm:$0xff] }
 0x44e   :  { %1542 = vmatpush3.bf16.msra.mxu0 %v1541_v11 }
 0x44f   :  { %v992_v14 = vpop.permute.xlu0 %991  ;;  %v1036_v26 = vld [vmem:[#allocation3 + $0x28] sm:$0xff]  ;;  %1543 = vmatprep.subr.bf16.mxu0 %v1663_v41 }
 0x450   :  { %1012 = vst.msk [vmem:[#allocation3 + $0x48] sm:$0xff] %vm1007_vm5, %v992_v14  ;;  %v1037_v40 = vadd.f32 %v1036_v26, %v1027_v29  ;;  %v1135_v26 = vld [vmem:[#allocation4 + $0x70] sm:$0xff] }
 0x452   :  { %1545 = vmatpush3.bf16.msra.mxu0 %v1544_v46 }
 0x453   :  { %v994_v21 = vpop.permute.xlu0 %993  ;;  %v1046_v31 = vld [vmem:[#allocation3 + $0x38] sm:$0xff]  ;;  %1546 = vmatprep.subr.bf16.mxu0 %v1663_v41 }
 0x454   :  { %1013 = vst.msk [vmem:[#allocation3 + $0x58] sm:$0xff] %vm1007_vm5, %v994_v21  ;;  %v1047_v45 = vadd.f32 %v1046_v31, %v1037_v40 }
 0x456   :  { %1548 = vmatpush3.bf16.msra.mxu0 %v1547_v54 }
 0x457   :  { %v996_v22 = vpop.permute.xlu0 %995  ;;  %v1056_v44 = vld [vmem:[#allocation3 + $0x48] sm:$0xff]  ;;  %1549 = vmatprep.subr.bf16.mxu0 %v1663_v41 }
 0x458   :  { %1014 = vst.msk [vmem:[#allocation3 + $0x68] sm:$0xff] %vm1007_vm5, %v996_v22  ;;  %v1057_v51 = vadd.f32 %v1056_v44, %v1047_v45  ;;  %v1134_v22 = vld [vmem:[#allocation4 + $0x68] sm:$0xff]  ;;  %v1140_v44 = vld [vmem:[#allocation4 + $0x90] sm:$0xff] }
 0x459   :  { %v1559_v31 = vpack.c.bf16 %v1135_v26, %v1134_v22 }
 0x45a   :  { %1551 = vmatpush3.bf16.msra.mxu0 %v1550_v61 }
 0x45b   :  { %v998_v43 = vpop.permute.xlu0 %997  ;;  %v1066_v47 = vld [vmem:[#allocation3 + $0x58] sm:$0xff]  ;;  %1552 = vmatprep.subr.bf16.mxu0 %v1663_v41 }
 0x45c   :  { %1015 = vst.msk [vmem:[#allocation3 + $0x78] sm:$0xff] %vm1007_vm5, %v998_v43  ;;  %v1067_v53 = vadd.f32 %v1066_v47, %v1057_v51  ;;  %v1139_v43 = vld [vmem:[#allocation4 + $0x88] sm:$0xff] }
 0x45d   :  { %v1565_v47 = vpack.c.bf16 %v1140_v44, %v1139_v43 }
 0x45e   :  { %1554 = vmatpush3.bf16.msra.mxu0 %v1553_v16 }
 0x45f   :  { %v1076_v52 = vld [vmem:[#allocation3 + $0x68] sm:$0xff]  ;;  %1555 = vmatprep.subr.bf16.mxu0 %v1663_v41  ;;  %1566 = vmatpush3.bf16.msra.mxu1 %v1565_v47 }
 0x460   :  { %v1077_v59 = vadd.f32 %v1076_v52, %v1067_v53  ;;  %1567 = vmatprep.subr.bf16.mxu1 %v1663_v41 }
 0x462   :  { %1557 = vmatpush3.bf16.msra.mxu0 %v1556_v19  ;;  %v1352_v19 = vld [vmem:[#allocation4 + $0x4] ss:$0 sm:$0xff] }
 0x463   :  { %v1086_v60 = vld [vmem:[#allocation3 + $0x78] sm:$0xff]  ;;  %1558 = vmatprep.subr.bf16.mxu0 %v1663_v41 }
 0x464   :  { %v1087_v1 = vadd.f32 %v1086_v60, %v1077_v59 }
 0x466   :  { %1104 = vrot.lane.b32.xlu1 %v1087_v1, %s1664_s17  ;;  %1560 = vmatpush3.bf16.msra.mxu0 %v1559_v31 }
 0x467   :  { %1561 = vmatprep.subr.bf16.mxu0 %v1663_v41 }
 0x498   :  { %v1022_v5 = vpop.permute.xlu1 %1021 }
 0x499   :  { %v1024_v28 = vmul.f32 %v1022_v5, %v1017_v34 }
 0x49b   :  { %v1025_v63 = vadd.f32 %v1024_v28, %v1019_v0 }
 0x49d   :  { %v1029_v32 = vadd.f32 %v2016_v2, %v1025_v63 }
 0x4a2   :  { %v1032_v30 = vpop.permute.xlu1 %1031 }
 0x4a3   :  { %v1034_v7 = vmul.f32 %v1032_v30, %v1027_v29  ;;  %v1136_v29 = vld [vmem:[#allocation4 + $0x78] sm:$0xff] }
 0x4a4   :  { %v1562_v33 = vpack.c.bf16 %v1137_v36, %v1136_v29 }
 0x4a5   :  { %v1035_v24 = vadd.f32 %v1034_v7, %v1029_v32 }
 0x4a6   :  { %v1042_v38 = vpop.permute.xlu1 %1041  ;;  %1563 = vmatpush3.bf16.msra.mxu0 %v1562_v33 }
 0x4a7   :  { %v1039_v35 = vadd.f32 %v2023_v3, %v1035_v24  ;;  %v1044_v9 = vmul.f32 %v1042_v38, %v1037_v40 }
 0x4a9   :  { %v1045_v58 = vadd.f32 %v1044_v9, %v1039_v35 }
 0x4aa   :  { %v1052_v37 = vpop.permute.xlu1 %1051 }
 0x4ab   :  { %v1049_v12 = vadd.f32 %v2029_v25, %v1045_v58  ;;  %v1054_v14 = vmul.f32 %v1052_v37, %v1047_v45  ;;  %v1141_v45 = vld [vmem:[#allocation4 + $0x98] sm:$0xff] }
 0x4ad   :  { %v1055_v21 = vadd.f32 %v1054_v14, %v1049_v12 }
 0x4ae   :  { %v1062_v20 = vpop.permute.xlu1 %1061 }
 0x4af   :  { %v1059_v34 = vadd.f32 %v2035_v27, %v1055_v21  ;;  %v1064_v49 = vmul.f32 %v1062_v20, %v1057_v51  ;;  %v1144_v51 = vld [vmem:[#allocation4 + $0xb0] sm:$0xff] }
 0x4b0   :  { %v1571_v52 = vpack.c.bf16 %v1144_v51, %v1143_v50 }
 0x4b1   :  { %v1065_v2 = vadd.f32 %v1064_v49, %v1059_v34 }
 0x4b2   :  { %v1072_v3 = vpop.permute.xlu1 %1071 }
 0x4b3   :  { %v1069_v25 = vadd.f32 %v2041_v8, %v1065_v2  ;;  %v1074_v27 = vmul.f32 %v1072_v3, %v1067_v53  ;;  %v1568_v8 = vpack.c.bf16 %v1142_v48, %v1141_v45 }
 0x4b5   :  { %v1075_v39 = vadd.f32 %v1074_v27, %v1069_v25  ;;  %1569 = vmatpush3.bf16.msra.mxu1 %v1568_v8 }
 0x4b6   :  { %v1082_v40 = vpop.permute.xlu0 %1081  ;;  %1570 = vmatprep.subr.bf16.mxu1 %v1663_v41 }
 0x4b7   :  { %v1079_v11 = vadd.f32 %v2048_v10, %v1075_v39  ;;  %v1084_v42 = vmul.f32 %v1082_v40, %v1077_v59 }
 0x4b9   :  { %v1085_v46 = vadd.f32 %v1084_v42, %v1079_v11  ;;  %1572 = vmatpush3.bf16.msra.mxu1 %v1571_v52 }
 0x4ba   :  { %1573 = vmatprep.subr.bf16.mxu1 %v1663_v41  ;;  %v1146_v41 = vld [vmem:[#allocation4 + $0xc0] sm:$0xff] }
 0x4bb   :  { %1110 = vrot.lane.b32.xlu1 %v1085_v46, %s1666_s18 }
 0x4c3   :  { %v1092_v10 = vpop.permute.xlu1 %1091 }
 0x4c4   :  { %v1094_v53 = vmul.f32 %v1092_v10, %v1730_v18 }
 0x4c7   :  { %v1097_v54 = vpop.permute.xlu0 %1096 }
 0x4c8   :  { %v1099_v55 = vmul.f32 %v1097_v54, %v1728_v17  ;;  %v1145_v17 = vld [vmem:[#allocation4 + $0xb8] sm:$0xff] }
 0x4c9   :  { %v1574_v62 = vpack.c.bf16 %v1146_v41, %v1145_v17 }
 0x4ca   :  { %v1100_v56 = vadd.f32 %v1099_v55, %v1094_v53 }
 0x4cb   :  { %v1116_v1 = vpop.permute.xlu0 %1115  ;;  %1575 = vmatpush3.bf16.msra.mxu1 %v1574_v62 }
 0x4cc   :  { %v1101_v59 = vadd.f32 %v1734_v23, %v1100_v56  ;;  %v1351_v23 = vld [vmem:[#allocation4 + $0x3] ss:$0 sm:$0xff] }
 0x4ce   :  { %1102 = vst.msk [vmem:[#allocation2] sm:$0xff] %vm163_vm1, %v1101_v59 }
 0x4d8   :  { %v1105_v60 = vpop.permute.xlu1 %1104 }
 0x4d9   :  { %1108 = vst.msk [vmem:[#allocation2] sm:$0xff] %vm1107_vm7, %v1105_v60 }
 0x52d   :  { %v1111_v61 = vpop.permute.xlu1 %1110 }
 0x52e   :  { %1114 = vst.msk [vmem:[#allocation2] sm:$0xff] %vm1113_vm8, %v1111_v61 }
 0x52f   :  { %1119 = vst.msk [vmem:[#allocation2] sm:$0xff] %vm1118_vm9, %v1116_v1 }
 0x530   :  { %1121 = vst.msk [vmem:[#allocation2] sm:$0xff] %vm1120_vm10, %v1654_v57 }
 0x537   :  { %v1148_v18 = vld [vmem:[#allocation2] sm:$0xff] }
 0x538   :  { %1511 = vmatmul.mubr.f32.vlgmr.msra.gmra.mrb[12].mxu0 %v1148_v18 }
 0x60b   :  { %v1219_v13 = vpop.f32.mrb[12].mxu0 }
 0x60c   :  { %v1220_v16 = vadd.f32 %v1351_v23, %v1219_v13  ;;  %v1512_v4 = vpop.f32.mrb[13].mxu0 }
 0x60e   :  { %v1223_v15 = vmax.f32 %v1220_v16, 0.0 }
 0x610   :  { %1530 = vmatmul.mubr.msk.f32.vlgmr.msra.gmra.mrb[20].mxu1 %vm933_vm3, %v1223_v15 }
 0x6e3   :  { %v1297_v5 = vpop.f32.mrb[20].mxu1 }
 0x6e4   :  { %v1298_v6 = vadd.f32 %v1352_v19, %v1297_v5  ;;  %v1531_v28 = vpop.f32.mrb[21].mxu1 }
 0x6e6   :  { %1301 = vst [vmem:[#allocation7] sm:$0xff] %v1298_v6 }
 0x6e7   :  { %1634 = shalt.err (!%p1631_p12)
}
 0x6e8   :  { %s1635_s24 = scalar_lea.hbm %s2103_s2, 128 }
 0x6e9   :  { %p1636_p13 = scmp.ne.s32.totalorder %s2103_s2, %s1635_s24  ;;  %p1639_p0 = scmp.lt.u32.totalorder %s1635_s24, %s2103_s2 }
 0x6eb   :  { %p1641_p1 = pnand %p1639_p0, %p1636_p13 }
 0x6ed   :  { %1644 = shalt.err (!%p1641_p1)
}
 0x6ee   :  { %1311 = dma.vmem_to_hbm [thread:$0]  %s1309_s20, 128, %s2103_s2, [#allocation6]  }
 0x6ef   :  { %1647 = dma.done.wait [#allocation6], 128  }
 0x6f0   :  { %1648 = vsyncadd [#allocation6], 4294967168 }
 0x6f1   :  { %1315 = vsyncpa [#allocation5], 1 }
 0x6f2   :  { %1316 = vsyncpa [#allocation6], 1 }

</bundles_post_ra>
